<compile_context>
chip_gen: v7x
topology: tpu7x:2x2x1
jax: 0.10.0
libtpu: 0.0.40
codegen_flags: <defaults>
</compile_context>

<pallas_src>
import functools
import math

import jax
import jax.numpy as jnp
from jax.experimental import pallas as pl
from jax.experimental.pallas import tpu as pltpu


def _round_up(x, m):
    return ((x + m - 1) // m) * m


# ---------------------------------------------------------------------------
# Fused Pallas kernel: phase-stacked matmul + streamed BN stats + SiLU
# ---------------------------------------------------------------------------
def _fused_conv_bn_act_kernel(w_ref, p_ref, g_ref, bt_ref, o_ref, sum_ref, sq_ref,
                              *, eps, nphase, m_true):
    """One conv / deconv layer, fully fused.

    w_ref  : [R, Kp]      bf16  phase-stacked weights, R = nphase*Cout_p (resident)
    p_ref  : [Kp, tm]     bf16  im2col patch tile for this M step (pipelined)
    g_ref  : [Cout_p, 1]  f32   BN gamma
    bt_ref : [Cout_p, 1]  f32   BN beta
    o_ref  : [R, Mp]      bf16  whole activation, VMEM resident across the grid
    sum_ref, sq_ref : [R, 1] f32  streamed per-row sum / sum-of-squares scratch
    """
    i = pl.program_id(0)
    nsteps = pl.num_programs(0)
    tm = p_ref.shape[1]
    cout = g_ref.shape[0]

    @pl.when(i == 0)
    def _init():
        sum_ref[...] = jnp.zeros_like(sum_ref)
        sq_ref[...] = jnp.zeros_like(sq_ref)

    # One tall matmul per step: all sub-pixel phases stacked along the result
    # rows -> a single MXU pass instead of nphase small [Cout, K] dots.
    y = jnp.dot(w_ref[...], p_ref[...], preferred_element_type=jnp.float32)  # [R, tm] f32

    # Streamed BN statistics (no bias anywhere, and padded M columns hold zero
    # patches, so they contribute exactly 0 to both sums).
    sum_ref[...] += jnp.sum(y, axis=1, keepdims=True)
    sq_ref[...] += jnp.sum(y * y, axis=1, keepdims=True)

    start = pl.multiple_of(i * tm, 128)
    o_ref[:, pl.ds(start, tm)] = y.astype(o_ref.dtype)

    # Last step: fold phase rows into per-channel stats, then one normalize +
    # SiLU sweep over the VMEM-resident bf16 activation.
    @pl.when(i == nsteps - 1)
    def _epilogue():
        s = sum_ref[...]
        q = sq_ref[...]
        s_c = s[0:cout, :]
        q_c = q[0:cout, :]
        for ph in range(1, nphase):                  # static, tiny fold across phases
            s_c = s_c + s[ph * cout:(ph + 1) * cout, :]
            q_c = q_c + q[ph * cout:(ph + 1) * cout, :]
        inv_count = 1.0 / float(nphase * m_true)
        mean = s_c * inv_count
        var = q_c * inv_count - mean * mean          # biased variance (BN training mode)
        scale_c = jax.lax.rsqrt(var + eps) * g_ref[...]
        shift_c = bt_ref[...] - mean * scale_c
        if nphase > 1:
            scale = jnp.concatenate([scale_c] * nphase, axis=0)   # [R, 1]
            shift = jnp.concatenate([shift_c] * nphase, axis=0)
        else:
            scale, shift = scale_c, shift_c
        z = o_ref[...].astype(jnp.float32) * scale + shift
        sig = pl.reciprocal(1.0 + jnp.exp(-z), approx=True)        # EUP exp + rcp
        o_ref[...] = (z * sig).astype(o_ref.dtype)


def fused_conv_bn_act(wmat, patches, gamma, beta, *, eps=1e-5, tm_target=512):
    """out[ph, c, m] = SiLU(BN_c(sum_k wmat[ph, c, k] * patches[k, m])), bf16.

    wmat   : [nphase, Cout, K]
    patches: [K, M]
    returns: [nphase, Cout, M] bf16
    """
    nphase, cout, k = wmat.shape
    k2, m = patches.shape
    assert k == k2

    cout_p = _round_up(cout, 8)           # sublane alignment of result rows
    k_p = _round_up(k, 16)                # bf16 sublane packing of the contraction
    m_p = _round_up(m, 128)               # lane-dense, unmasked stores
    r = nphase * cout_p

    w = jnp.pad(wmat.astype(jnp.bfloat16),
                ((0, 0), (0, cout_p - cout), (0, k_p - k))).reshape(r, k_p)
    p = jnp.pad(patches.astype(jnp.bfloat16), ((0, k_p - k), (0, m_p - m)))
    g = jnp.pad(gamma.reshape(cout, 1).astype(jnp.float32),
                ((0, cout_p - cout), (0, 0)), constant_values=1.0)
    b = jnp.pad(beta.reshape(cout, 1).astype(jnp.float32),
                ((0, cout_p - cout), (0, 0)))

    # Lane tile for the pipelined M axis: largest 128-multiple <= tm_target
    # that divides the padded M.
    tm = max(128, min(tm_target, m_p) - (min(tm_target, m_p) % 128))
    while m_p % tm != 0:
        tm -= 128
    nsteps = m_p // tm

    # Explicit VMEM budget derived from actual residency (bf16 resident output
    # + double-buffered patch tile + weights + scratch), with 2x headroom.
    need = (r * m_p * 2 + 2 * k_p * tm * 2 + 2 * r * k_p * 2
            + 2 * r * 128 * 4 + 4 * cout_p * 128 * 4)
    vmem_limit = min(100 * 1024 * 1024, max(2 * need + (4 << 20), 16 << 20))

    out = pl.pallas_call(
        functools.partial(_fused_conv_bn_act_kernel, eps=eps, nphase=nphase, m_true=m),
        out_shape=jax.ShapeDtypeStruct((r, m_p), jnp.bfloat16),
        grid=(nsteps,),
        in_specs=[
            pl.BlockSpec((r, k_p), lambda i: (0, 0)),        # stacked phase weights
            pl.BlockSpec((k_p, tm), lambda i: (0, i)),       # patch tile (pipelined)
            pl.BlockSpec((cout_p, 1), lambda i: (0, 0)),     # gamma
            pl.BlockSpec((cout_p, 1), lambda i: (0, 0)),     # beta
        ],
        out_specs=pl.BlockSpec((r, m_p), lambda i: (0, 0)),  # resident across M
        scratch_shapes=[pltpu.VMEM((r, 1), jnp.float32),     # streamed sum
                        pltpu.VMEM((r, 1), jnp.float32)],    # streamed sum of squares
        compiler_params=pltpu.CompilerParams(
            # Output block is resident across the M axis (BN needs all of M),
            # so this axis must be sequential ("arbitrary").
            dimension_semantics=("arbitrary",),
            vmem_limit_bytes=int(vmem_limit),
        ),
    )(w, p, g, b)
    return out.reshape(nphase, cout_p, m_p)[:, :cout, :m]


# ---------------------------------------------------------------------------
# Glue: transposed im2col (CNHW) and layer wrappers
# ---------------------------------------------------------------------------
def _im2col_T(x_cnhw, kh, kw, stride):
    """im2col on a CNHW tensor -> transposed patch matrix [C*kh*kw, N*Ho*Wo].

    K ordering is (c, i, j), matching weight.reshape(Cout, C*kh*kw);
    column ordering is (n, ho, wo) row-major.
    """
    c, n, h, w = x_cnhw.shape
    ho = (h - kh) // stride + 1
    wo = (w - kw) // stride + 1
    taps = []
    for i in range(kh):
        for j in range(kw):
            taps.append(x_cnhw[:, :, i:i + stride * ho:stride, j:j + stride * wo:stride])
    p = jnp.stack(taps, axis=1)                     # [C, kh*kw, N, Ho, Wo]
    return p.reshape(c * kh * kw, n * ho * wo), n, ho, wo


def _conv2d_bn_silu(x_cnhw, w, g, bt, *, stride, pad, eps=1e-5):
    """Conv2d (bias-free: BN cancels it exactly) + BN + SiLU, CNHW in/out (bf16)."""
    cout, cin, kh, kw = w.shape
    xp = jnp.pad(x_cnhw, ((0, 0), (0, 0), (pad, pad), (pad, pad)))
    patches, n, ho, wo = _im2col_T(xp, kh, kw, stride)
    wmat = w.reshape(1, cout, cin * kh * kw)
    out = fused_conv_bn_act(wmat, patches, g, bt, eps=eps)      # [1, Cout, M] bf16
    return out.reshape(cout, n, ho, wo)                         # CNHW


# (phase offset a/b, 3x3 window offset) -> 4x4 kernel tap index, for s=2, p=1.
_PHASE_TAP = {(0, 0): 3, (0, 1): 1, (1, 1): 2, (1, 2): 0}


def _subpixel_weights(w):
    """ConvTranspose2d weight [Cin, Cout, 4, 4] (stride=2, padding=1) ->
    per-sub-pixel-phase 3x3 conv weights [4, Cout, Cin*9] over the 1-padded input."""
    cin, cout, kh, kw = w.shape
    g = jnp.zeros((2, 2, cout, cin, 3, 3), w.dtype)
    for (a, rh), th in _PHASE_TAP.items():
        for (b, rw), tw in _PHASE_TAP.items():
            g = g.at[a, b, :, :, rh, rw].set(w[:, :, th, tw].T)   # [Cout, Cin]
    return g.reshape(4, cout, cin * 9)


def _conv_transpose2d_bn_silu(x_cnhw, w, g, bt, *, stride, pad, eps=1e-5):
    """ConvTranspose2d (bias-free) + BN + SiLU, CNHW in/out (bf16)."""
    cin, cout, kh, kw = w.shape
    c, n, h, wd = x_cnhw.shape
    if stride == 2 and kh == 4 and kw == 4 and pad == 1:
        # Sub-pixel decomposition: 4 phases of 3x3 stride-1 convs sharing one
        # patch matrix of the 1-padded input; no zero-dilated intermediate.
        xp = jnp.pad(x_cnhw, ((0, 0), (0, 0), (1, 1), (1, 1)))
        patches, _, _, _ = _im2col_T(xp, 3, 3, 1)                 # [Cin*9, N*H*W]
        w9 = _subpixel_weights(w)                                 # [4, Cout, Cin*9]
        out = fused_conv_bn_act(w9, patches, g, bt, eps=eps)      # [4, Cout, N*H*W]
        out = out.reshape(2, 2, cout, n, h, wd)                   # [a, b, c, n, h, w]
        out = out.transpose(2, 3, 4, 0, 5, 1)                     # [c, n, h, a, w, b]
        return out.reshape(cout, n, 2 * h, 2 * wd)                # pixel-shuffle -> CNHW
    # General fallback: zero-dilate + stride-1 conv with the flipped kernel.
    assert kh == kw and kh - 1 - pad >= 0
    hd, wdd = (h - 1) * stride + 1, (wd - 1) * stride + 1
    xd = jnp.zeros((c, n, hd, wdd), x_cnhw.dtype)
    xd = xd.at[:, :, ::stride, ::stride].set(x_cnhw)
    wc = jnp.flip(w, axis=(2, 3)).transpose(1, 0, 2, 3)           # [Cout, Cin, kh, kw]
    return _conv2d_bn_silu(xd, wc, g, bt, stride=1, pad=kh - 1 - pad, eps=eps)


def deconv2d_padding(input_dim, output_dim, kernel_size, stride):
    no_pad = (input_dim - 1) * stride + kernel_size
    padding = math.ceil(max(no_pad - output_dim, 0) / 2)
    output_padding = max(output_dim - (no_pad - 2 * padding), 0)
    assert no_pad - 2 * padding + output_padding == output_dim
    return padding, output_padding


# ---------------------------------------------------------------------------
# Module: parameter init + forward
# ---------------------------------------------------------------------------
def _uniform(key, shape, bound):
    return jax.random.uniform(key, shape, jnp.float32, -bound, bound)


def init_params(key, in_chans, out_chans):
    ks = jax.random.split(key, 6)
    p = {}
    # bottleneck[0]: Conv2d(in_chans, out_chans, 4, 2, 1)   weight [Cout, Cin, 4, 4]
    bound = 1.0 / math.sqrt(in_chans * 16)
    p["w1"] = _uniform(ks[0], (out_chans, in_chans, 4, 4), bound)
    p["b1"] = _uniform(ks[1], (out_chans,), bound)     # inert: BN cancels it exactly
    p["g1"] = jnp.ones((out_chans,), jnp.float32)
    p["bt1"] = jnp.zeros((out_chans,), jnp.float32)
    # bottleneck[3]: ConvTranspose2d(out_chans, out_chans, 4, 2, 1)  weight [Cin, Cout, 4, 4]
    bound = 1.0 / math.sqrt(out_chans * 16)
    p["w2"] = _uniform(ks[2], (out_chans, out_chans, 4, 4), bound)
    p["b2"] = _uniform(ks[3], (out_chans,), bound)
    p["g2"] = jnp.ones((out_chans,), jnp.float32)
    p["bt2"] = jnp.zeros((out_chans,), jnp.float32)
    # upsample[0]: ConvTranspose2d(in_chans + out_chans, out_chans, 4, 2, pad)
    bound = 1.0 / math.sqrt(out_chans * 16)
    p["w3"] = _uniform(ks[4], (in_chans + out_chans, out_chans, 4, 4), bound)
    p["b3"] = _uniform(ks[5], (out_chans,), bound)
    p["g3"] = jnp.ones((out_chans,), jnp.float32)
    p["bt3"] = jnp.zeros((out_chans,), jnp.float32)
    return p


def conv_transpose_block2d_forward(features_nchw, params, up_pad):
    # NCHW -> CNHW once; activations stay bf16 + CNHW between layers.
    x = jnp.transpose(features_nchw, (1, 0, 2, 3)).astype(jnp.bfloat16)
    # bottleneck: Conv(4,2,1) -> BN -> SiLU -> ConvT(4,2,1) -> BN -> SiLU
    h = _conv2d_bn_silu(x, params["w1"], params["g1"], params["bt1"], stride=2, pad=1)
    h = _conv_transpose2d_bn_silu(h, params["w2"], params["g2"], params["bt2"],
                                  stride=2, pad=1)
    # torch.cat((features, bottleneck(features)), dim=-3): channel concat in CNHW
    hidden = jnp.concatenate([x, h], axis=0)
    # upsample: ConvT(4,2,up_pad) -> BN -> SiLU
    y = _conv_transpose2d_bn_silu(hidden, params["w3"], params["g3"], params["bt3"],
                                  stride=2, pad=up_pad)
    return jnp.transpose(y, (1, 0, 2, 3)).astype(jnp.float32)   # back to NCHW, f32


# ---------------------------------------------------------------------------
# Pure-JAX f32 reference (lax.conv) of the PyTorch module's forward
# ---------------------------------------------------------------------------
def _reference_forward(x, params, up_pad, eps=1e-5):
    def bn_silu(y, g, b):
        mean = jnp.mean(y, axis=(0, 2, 3), keepdims=True)
        var = jnp.mean((y - mean) ** 2, axis=(0, 2, 3), keepdims=True)
        z = (y - mean) * jax.lax.rsqrt(var + eps) * g.reshape(1, -1, 1, 1) \
            + b.reshape(1, -1, 1, 1)
        return z * jax.nn.sigmoid(z)

    def conv(xx, w, b, stride, pad):
        y = jax.lax.conv_general_dilated(
            xx, w, (stride, stride), [(pad, pad), (pad, pad)],
            dimension_numbers=("NCHW", "OIHW", "NCHW"))
        return y + b.reshape(1, -1, 1, 1)

    def deconv(xx, w, b, stride, pad):
        kh, kw = w.shape[2], w.shape[3]
        wc = jnp.flip(w, axis=(2, 3)).transpose(1, 0, 2, 3)
        y = jax.lax.conv_general_dilated(
            xx, wc, (1, 1),
            [(kh - 1 - pad, kh - 1 - pad), (kw - 1 - pad, kw - 1 - pad)],
            lhs_dilation=(stride, stride),
            dimension_numbers=("NCHW", "OIHW", "NCHW"))
        return y + b.reshape(1, -1, 1, 1)

    h = bn_silu(conv(x, params["w1"], params["b1"], 2, 1), params["g1"], params["bt1"])
    h = bn_silu(deconv(h, params["w2"], params["b2"], 2, 1), params["g2"], params["bt2"])
    hidden = jnp.concatenate([x, h], axis=1)
    return bn_silu(deconv(hidden, params["w3"], params["b3"], 2, up_pad),
                   params["g3"], params["bt3"])


# ---------------------------------------------------------------------------
if __name__ == "__main__":
    in_chans, in_side, out_chans, out_side = 4, 16, 8, 32
    batch = 2

    key = jax.random.PRNGKey(0)
    kx, kp = jax.random.split(key)
    x = jax.random.normal(kx, (batch, in_chans, in_side, in_side), jnp.float32)
    params = init_params(kp, in_chans, out_chans)
    # The PyTorch module passes only padding[0] to the upsample ConvTranspose2d
    # (output_padding stays at its default 0) -> mirror that exactly.
    up_pad, _ = deconv2d_padding(in_side, out_side, 4, 2)

    fwd = jax.jit(functools.partial(conv_transpose_block2d_forward, up_pad=up_pad))
    out = fwd(x, params)
    jax.block_until_ready(out)

    assert out.shape == (batch, out_chans, out_side, out_side), out.shape
    assert bool(jnp.all(jnp.isfinite(out)))

    # Cross-check against the pure-JAX f32 reference (tolerance covers the bf16
    # MXU operands and the bf16 inter-layer activations).
    ref = jax.jit(functools.partial(_reference_forward, up_pad=up_pad))(x, params)
    rel_err = float(jnp.linalg.norm(out - ref) / jnp.linalg.norm(ref))
    assert rel_err < 5e-2, f"relative error vs reference: {rel_err}"

    print("KERNEL_OK")
</pallas_src>

<mosaic_0001>
module attributes {stable_mosaic.version = 11 : i64} {
  func.func @_fused_conv_bn_act_kernel(%arg0: i32, %arg1: memref<8x64xbf16, #tpu.memory_space<vmem>>, %arg2: memref<64x128xbf16, #tpu.memory_space<vmem>>, %arg3: memref<8x1xf32, #tpu.memory_space<vmem>>, %arg4: memref<8x1xf32, #tpu.memory_space<vmem>>, %arg5: memref<8x128xbf16, #tpu.memory_space<vmem>>, %arg6: memref<8x1xf32, #tpu.memory_space<vmem>>, %arg7: memref<8x1xf32, #tpu.memory_space<vmem>>) attributes {dimension_semantics = [#tpu.dimension_semantics<arbitrary>], iteration_bounds = array<i64: 1>, scalar_prefetch = 0 : i64, scratch_operands = 2 : i64, tpu.core_type = #tpu.core_type<tc>, window_params = [{pipeline_mode = #tpu.pipeline_mode<synchronous>, transform_indices = @transform_0, window_bounds = array<i64: 8, 64>}, {transform_indices = @transform_1, window_bounds = array<i64: 64, 128>}, {pipeline_mode = #tpu.pipeline_mode<synchronous>, transform_indices = @transform_2, window_bounds = array<i64: 8, 1>}, {pipeline_mode = #tpu.pipeline_mode<synchronous>, transform_indices = @transform_3, window_bounds = array<i64: 8, 1>}, {pipeline_mode = #tpu.pipeline_mode<synchronous>, transform_indices = @transform_4, window_bounds = array<i64: 8, 128>}]} {
    %c0_i32 = arith.constant 0 : i32
    %0 = arith.cmpi eq, %arg0, %c0_i32 : i32
    %1 = arith.extui %0 : i1 to i32
    %c0_i32_0 = arith.constant 0 : i32
    %2 = arith.cmpi ne, %1, %c0_i32_0 : i32
    scf.if %2 {
      %cst_17 = arith.constant 0.000000e+00 : f32
      %25 = vector.broadcast %cst_17 : f32 to vector<8x1xf32>
      %c0_18 = arith.constant 0 : index
      %c0_19 = arith.constant 0 : index
      %26 = vector.load %arg6[%c0_18, %c0_19] : memref<8x1xf32, #tpu.memory_space<vmem>>, vector<8x1xf32>
      tpu.vector_store %arg6[%c0_18, %c0_19], %25 {strides = array<i32>} : memref<8x1xf32, #tpu.memory_space<vmem>>, vector<8x1xf32>,
      %cst_20 = arith.constant 0.000000e+00 : f32
      %27 = vector.broadcast %cst_20 : f32 to vector<8x1xf32>
      %c0_21 = arith.constant 0 : index
      %c0_22 = arith.constant 0 : index
      %28 = vector.load %arg7[%c0_21, %c0_22] : memref<8x1xf32, #tpu.memory_space<vmem>>, vector<8x1xf32>
      tpu.vector_store %arg7[%c0_21, %c0_22], %27 {strides = array<i32>} : memref<8x1xf32, #tpu.memory_space<vmem>>, vector<8x1xf32>,
    } else {
    }
    %c0 = arith.constant 0 : index
    %c0_1 = arith.constant 0 : index
    %3 = vector.load %arg1[%c0, %c0_1] : memref<8x64xbf16, #tpu.memory_space<vmem>>, vector<8x64xbf16>
    %c0_2 = arith.constant 0 : index
    %c0_3 = arith.constant 0 : index
    %4 = vector.load %arg2[%c0_2, %c0_3] : memref<64x128xbf16, #tpu.memory_space<vmem>>, vector<64x128xbf16>
    %cst = arith.constant dense<0.000000e+00> : vector<8x128xf32>
    %5 = tpu.matmul %3, %4, %cst {dimension_numbers = #tpu.dot_dimension_numbers<[1], [0], [0], [1], [0, 0, 1, 1], [], []>} : vector<8x64xbf16>, vector<64x128xbf16>, vector<8x128xf32> -> vector<8x128xf32>
    %c0_4 = arith.constant 0 : index
    %c0_5 = arith.constant 0 : index
    %6 = vector.load %arg6[%c0_4, %c0_5] : memref<8x1xf32, #tpu.memory_space<vmem>>, vector<8x1xf32>
    %cst_6 = arith.constant dense<0.000000e+00> : vector<8xf32>
    %7 = vector.multi_reduction <add>, %5, %cst_6 [1] : vector<8x128xf32> to vector<8xf32>
    %8 = vector.shape_cast %7 : vector<8xf32> to vector<8x1xf32>
    %9 = arith.addf %6, %8 : vector<8x1xf32>
    %c0_7 = arith.constant 0 : index
    %c0_8 = arith.constant 0 : index
    %10 = vector.load %arg6[%c0_7, %c0_8] : memref<8x1xf32, #tpu.memory_space<vmem>>, vector<8x1xf32>
    tpu.vector_store %arg6[%c0_7, %c0_8], %9 {strides = array<i32>} : memref<8x1xf32, #tpu.memory_space<vmem>>, vector<8x1xf32>,
    %c0_9 = arith.constant 0 : index
    %c0_10 = arith.constant 0 : index
    %11 = vector.load %arg7[%c0_9, %c0_10] : memref<8x1xf32, #tpu.memory_space<vmem>>, vector<8x1xf32>
    %12 = arith.mulf %5, %5 : vector<8x128xf32>
    %cst_11 = arith.constant dense<0.000000e+00> : vector<8xf32>
    %13 = vector.multi_reduction <add>, %12, %cst_11 [1] : vector<8x128xf32> to vector<8xf32>
    %14 = vector.shape_cast %13 : vector<8xf32> to vector<8x1xf32>
    %15 = arith.addf %11, %14 : vector<8x1xf32>
    %c0_12 = arith.constant 0 : index
    %c0_13 = arith.constant 0 : index
    %16 = vector.load %arg7[%c0_12, %c0_13] : memref<8x1xf32, #tpu.memory_space<vmem>>, vector<8x1xf32>
    tpu.vector_store %arg7[%c0_12, %c0_13], %15 {strides = array<i32>} : memref<8x1xf32, #tpu.memory_space<vmem>>, vector<8x1xf32>,
    %c128_i32 = arith.constant 128 : i32
    %17 = arith.muli %arg0, %c128_i32 : i32
    %18 = tpu.assume_multiple %17, 128 : i32
    %19 = arith.truncf %5 : vector<8x128xf32> to vector<8x128xbf16>
    %c0_14 = arith.constant 0 : index
    %20 = arith.index_cast %18 : i32 to index
    %21 = vector.load %arg5[%c0_14, %20] : memref<8x128xbf16, #tpu.memory_space<vmem>>, vector<8x128xbf16>
    tpu.vector_store %arg5[%c0_14, %20], %19 {strides = array<i32>} : memref<8x128xbf16, #tpu.memory_space<vmem>>, vector<8x128xbf16>,
    %c0_i32_15 = arith.constant 0 : i32
    %22 = arith.cmpi eq, %arg0, %c0_i32_15 : i32
    %23 = arith.extui %22 : i1 to i32
    %c0_i32_16 = arith.constant 0 : i32
    %24 = arith.cmpi ne, %23, %c0_i32_16 : i32
    scf.if %24 {
      %c0_17 = arith.constant 0 : index
      %c0_18 = arith.constant 0 : index
      %25 = vector.load %arg6[%c0_17, %c0_18] : memref<8x1xf32, #tpu.memory_space<vmem>>, vector<8x1xf32>
      %c0_19 = arith.constant 0 : index
      %c0_20 = arith.constant 0 : index
      %26 = vector.load %arg7[%c0_19, %c0_20] : memref<8x1xf32, #tpu.memory_space<vmem>>, vector<8x1xf32>
      %cst_21 = arith.constant 7.812500e-03 : f32
      %27 = vector.broadcast %cst_21 : f32 to vector<8x1xf32>
      %28 = arith.mulf %25, %27 : vector<8x1xf32>
      %cst_22 = arith.constant 7.812500e-03 : f32
      %29 = vector.broadcast %cst_22 : f32 to vector<8x1xf32>
      %30 = arith.mulf %26, %29 : vector<8x1xf32>
      %31 = arith.mulf %28, %28 : vector<8x1xf32>
      %32 = arith.subf %30, %31 : vector<8x1xf32>
      %cst_23 = arith.constant 9.99999974E-6 : f32
      %33 = vector.broadcast %cst_23 : f32 to vector<8x1xf32>
      %34 = arith.addf %32, %33 : vector<8x1xf32>
      %35 = math.rsqrt %34 : vector<8x1xf32>
      %c0_24 = arith.constant 0 : index
      %c0_25 = arith.constant 0 : index
      %36 = vector.load %arg3[%c0_24, %c0_25] : memref<8x1xf32, #tpu.memory_space<vmem>>, vector<8x1xf32>
      %37 = arith.mulf %35, %36 : vector<8x1xf32>
      %c0_26 = arith.constant 0 : index
      %c0_27 = arith.constant 0 : index
      %38 = vector.load %arg4[%c0_26, %c0_27] : memref<8x1xf32, #tpu.memory_space<vmem>>, vector<8x1xf32>
      %39 = arith.mulf %28, %37 : vector<8x1xf32>
      %40 = arith.subf %38, %39 : vector<8x1xf32>
      %c0_28 = arith.constant 0 : index
      %c0_29 = arith.constant 0 : index
      %41 = vector.load %arg5[%c0_28, %c0_29] : memref<8x128xbf16, #tpu.memory_space<vmem>>, vector<8x128xbf16>
      %42 = arith.extf %41 : vector<8x128xbf16> to vector<8x128xf32>
      %43 = vector.broadcast %37 : vector<8x1xf32> to vector<8x128xf32>
      %44 = arith.mulf %42, %43 : vector<8x128xf32>
      %45 = vector.broadcast %40 : vector<8x1xf32> to vector<8x128xf32>
      %46 = arith.addf %44, %45 : vector<8x128xf32>
      %cst_30 = arith.constant 0.000000e+00 : f32
      %47 = vector.broadcast %cst_30 : f32 to vector<8x128xf32>
      %48 = arith.subf %47, %46 : vector<8x128xf32>
      %49 = math.exp %48 : vector<8x128xf32>
      %cst_31 = arith.constant 1.000000e+00 : f32
      %50 = vector.broadcast %cst_31 : f32 to vector<8x128xf32>
      %51 = arith.addf %50, %49 : vector<8x128xf32>
      %52 = tpu.reciprocal %51 {approx = true} : vector<8x128xf32> -> vector<8x128xf32>
      %53 = arith.mulf %46, %52 : vector<8x128xf32>
      %54 = arith.truncf %53 : vector<8x128xf32> to vector<8x128xbf16>
      %c0_32 = arith.constant 0 : index
      %c0_33 = arith.constant 0 : index
      %55 = vector.load %arg5[%c0_32, %c0_33] : memref<8x128xbf16, #tpu.memory_space<vmem>>, vector<8x128xbf16>
      tpu.vector_store %arg5[%c0_32, %c0_33], %54 {strides = array<i32>} : memref<8x128xbf16, #tpu.memory_space<vmem>>, vector<8x128xbf16>,
    } else {
    }
    return
  }
  func.func @transform_0(%arg0: i32) -> (i32, i32) {
    %c0_i32 = arith.constant 0 : i32
    %c0_i32_0 = arith.constant 0 : i32
    %c0_i32_1 = arith.constant 0 : i32
    return %c0_i32, %c0_i32_0 : i32, i32
  }
  func.func @transform_1(%arg0: i32) -> (i32, i32) {
    %c0_i32 = arith.constant 0 : i32
    %c0_i32_0 = arith.constant 0 : i32
    return %c0_i32, %arg0 : i32, i32
  }
  func.func @transform_2(%arg0: i32) -> (i32, i32) {
    %c0_i32 = arith.constant 0 : i32
    %c0_i32_0 = arith.constant 0 : i32
    %c0_i32_1 = arith.constant 0 : i32
    return %c0_i32, %c0_i32_0 : i32, i32
  }
  func.func @transform_3(%arg0: i32) -> (i32, i32) {
    %c0_i32 = arith.constant 0 : i32
    %c0_i32_0 = arith.constant 0 : i32
    %c0_i32_1 = arith.constant 0 : i32
    return %c0_i32, %c0_i32_0 : i32, i32
  }
  func.func @transform_4(%arg0: i32) -> (i32, i32) {
    %c0_i32 = arith.constant 0 : i32
    %c0_i32_0 = arith.constant 0 : i32
    %c0_i32_1 = arith.constant 0 : i32
    return %c0_i32, %c0_i32_0 : i32, i32
  }
}

module attributes {stable_mosaic.version = 11 : i64} {
  func.func @_fused_conv_bn_act_kernel(%arg0: i32, %arg1: memref<32x80xbf16, #tpu.memory_space<vmem>>, %arg2: memref<80x128xbf16, #tpu.memory_space<vmem>>, %arg3: memref<8x1xf32, #tpu.memory_space<vmem>>, %arg4: memref<8x1xf32, #tpu.memory_space<vmem>>, %arg5: memref<32x128xbf16, #tpu.memory_space<vmem>>, %arg6: memref<32x1xf32, #tpu.memory_space<vmem>>, %arg7: memref<32x1xf32, #tpu.memory_space<vmem>>) attributes {dimension_semantics = [#tpu.dimension_semantics<arbitrary>], iteration_bounds = array<i64: 1>, scalar_prefetch = 0 : i64, scratch_operands = 2 : i64, tpu.core_type = #tpu.core_type<tc>, window_params = [{pipeline_mode = #tpu.pipeline_mode<synchronous>, transform_indices = @transform_0, window_bounds = array<i64: 32, 80>}, {transform_indices = @transform_1, window_bounds = array<i64: 80, 128>}, {pipeline_mode = #tpu.pipeline_mode<synchronous>, transform_indices = @transform_2, window_bounds = array<i64: 8, 1>}, {pipeline_mode = #tpu.pipeline_mode<synchronous>, transform_indices = @transform_3, window_bounds = array<i64: 8, 1>}, {pipeline_mode = #tpu.pipeline_mode<synchronous>, transform_indices = @transform_4, window_bounds = array<i64: 32, 128>}]} {
    %c0_i32 = arith.constant 0 : i32
    %0 = arith.cmpi eq, %arg0, %c0_i32 : i32
    %1 = arith.extui %0 : i1 to i32
    %c0_i32_0 = arith.constant 0 : i32
    %2 = arith.cmpi ne, %1, %c0_i32_0 : i32
    scf.if %2 {
      %cst_17 = arith.constant 0.000000e+00 : f32
      %25 = vector.broadcast %cst_17 : f32 to vector<32x1xf32>
      %c0_18 = arith.constant 0 : index
      %c0_19 = arith.constant 0 : index
      %26 = vector.load %arg6[%c0_18, %c0_19] : memref<32x1xf32, #tpu.memory_space<vmem>>, vector<32x1xf32>
      tpu.vector_store %arg6[%c0_18, %c0_19], %25 {strides = array<i32>} : memref<32x1xf32, #tpu.memory_space<vmem>>, vector<32x1xf32>,
      %cst_20 = arith.constant 0.000000e+00 : f32
      %27 = vector.broadcast %cst_20 : f32 to vector<32x1xf32>
      %c0_21 = arith.constant 0 : index
      %c0_22 = arith.constant 0 : index
      %28 = vector.load %arg7[%c0_21, %c0_22] : memref<32x1xf32, #tpu.memory_space<vmem>>, vector<32x1xf32>
      tpu.vector_store %arg7[%c0_21, %c0_22], %27 {strides = array<i32>} : memref<32x1xf32, #tpu.memory_space<vmem>>, vector<32x1xf32>,
    } else {
    }
    %c0 = arith.constant 0 : index
    %c0_1 = arith.constant 0 : index
    %3 = vector.load %arg1[%c0, %c0_1] : memref<32x80xbf16, #tpu.memory_space<vmem>>, vector<32x80xbf16>
    %c0_2 = arith.constant 0 : index
    %c0_3 = arith.constant 0 : index
    %4 = vector.load %arg2[%c0_2, %c0_3] : memref<80x128xbf16, #tpu.memory_space<vmem>>, vector<80x128xbf16>
    %cst = arith.constant dense<0.000000e+00> : vector<32x128xf32>
    %5 = tpu.matmul %3, %4, %cst {dimension_numbers = #tpu.dot_dimension_numbers<[1], [0], [0], [1], [0, 0, 1, 1], [], []>} : vector<32x80xbf16>, vector<80x128xbf16>, vector<32x128xf32> -> vector<32x128xf32>
    %c0_4 = arith.constant 0 : index
    %c0_5 = arith.constant 0 : index
    %6 = vector.load %arg6[%c0_4, %c0_5] : memref<32x1xf32, #tpu.memory_space<vmem>>, vector<32x1xf32>
    %cst_6 = arith.constant dense<0.000000e+00> : vector<32xf32>
    %7 = vector.multi_reduction <add>, %5, %cst_6 [1] : vector<32x128xf32> to vector<32xf32>
    %8 = vector.shape_cast %7 : vector<32xf32> to vector<32x1xf32>
    %9 = arith.addf %6, %8 : vector<32x1xf32>
    %c0_7 = arith.constant 0 : index
    %c0_8 = arith.constant 0 : index
    %10 = vector.load %arg6[%c0_7, %c0_8] : memref<32x1xf32, #tpu.memory_space<vmem>>, vector<32x1xf32>
    tpu.vector_store %arg6[%c0_7, %c0_8], %9 {strides = array<i32>} : memref<32x1xf32, #tpu.memory_space<vmem>>, vector<32x1xf32>,
    %c0_9 = arith.constant 0 : index
    %c0_10 = arith.constant 0 : index
    %11 = vector.load %arg7[%c0_9, %c0_10] : memref<32x1xf32, #tpu.memory_space<vmem>>, vector<32x1xf32>
    %12 = arith.mulf %5, %5 : vector<32x128xf32>
    %cst_11 = arith.constant dense<0.000000e+00> : vector<32xf32>
    %13 = vector.multi_reduction <add>, %12, %cst_11 [1] : vector<32x128xf32> to vector<32xf32>
    %14 = vector.shape_cast %13 : vector<32xf32> to vector<32x1xf32>
    %15 = arith.addf %11, %14 : vector<32x1xf32>
    %c0_12 = arith.constant 0 : index
    %c0_13 = arith.constant 0 : index
    %16 = vector.load %arg7[%c0_12, %c0_13] : memref<32x1xf32, #tpu.memory_space<vmem>>, vector<32x1xf32>
    tpu.vector_store %arg7[%c0_12, %c0_13], %15 {strides = array<i32>} : memref<32x1xf32, #tpu.memory_space<vmem>>, vector<32x1xf32>,
    %c128_i32 = arith.constant 128 : i32
    %17 = arith.muli %arg0, %c128_i32 : i32
    %18 = tpu.assume_multiple %17, 128 : i32
    %19 = arith.truncf %5 : vector<32x128xf32> to vector<32x128xbf16>
    %c0_14 = arith.constant 0 : index
    %20 = arith.index_cast %18 : i32 to index
    %21 = vector.load %arg5[%c0_14, %20] : memref<32x128xbf16, #tpu.memory_space<vmem>>, vector<32x128xbf16>
    tpu.vector_store %arg5[%c0_14, %20], %19 {strides = array<i32>} : memref<32x128xbf16, #tpu.memory_space<vmem>>, vector<32x128xbf16>,
    %c0_i32_15 = arith.constant 0 : i32
    %22 = arith.cmpi eq, %arg0, %c0_i32_15 : i32
    %23 = arith.extui %22 : i1 to i32
    %c0_i32_16 = arith.constant 0 : i32
    %24 = arith.cmpi ne, %23, %c0_i32_16 : i32
    scf.if %24 {
      %c0_17 = arith.constant 0 : index
      %c0_18 = arith.constant 0 : index
      %25 = vector.load %arg6[%c0_17, %c0_18] : memref<32x1xf32, #tpu.memory_space<vmem>>, vector<32x1xf32>
      %c0_19 = arith.constant 0 : index
      %c0_20 = arith.constant 0 : index
      %26 = vector.load %arg7[%c0_19, %c0_20] : memref<32x1xf32, #tpu.memory_space<vmem>>, vector<32x1xf32>
      %27 = vector.extract_strided_slice %25 {offsets = [0, 0], sizes = [8, 1], strides = [1, 1]} : vector<32x1xf32> to vector<8x1xf32>
      %28 = vector.extract_strided_slice %26 {offsets = [0, 0], sizes = [8, 1], strides = [1, 1]} : vector<32x1xf32> to vector<8x1xf32>
      %29 = vector.extract_strided_slice %25 {offsets = [8, 0], sizes = [8, 1], strides = [1, 1]} : vector<32x1xf32> to vector<8x1xf32>
      %30 = arith.addf %27, %29 : vector<8x1xf32>
      %31 = vector.extract_strided_slice %26 {offsets = [8, 0], sizes = [8, 1], strides = [1, 1]} : vector<32x1xf32> to vector<8x1xf32>
      %32 = arith.addf %28, %31 : vector<8x1xf32>
      %33 = vector.extract_strided_slice %25 {offsets = [16, 0], sizes = [8, 1], strides = [1, 1]} : vector<32x1xf32> to vector<8x1xf32>
      %34 = arith.addf %30, %33 : vector<8x1xf32>
      %35 = vector.extract_strided_slice %26 {offsets = [16, 0], sizes = [8, 1], strides = [1, 1]} : vector<32x1xf32> to vector<8x1xf32>
      %36 = arith.addf %32, %35 : vector<8x1xf32>
      %37 = vector.extract_strided_slice %25 {offsets = [24, 0], sizes = [8, 1], strides = [1, 1]} : vector<32x1xf32> to vector<8x1xf32>
      %38 = arith.addf %34, %37 : vector<8x1xf32>
      %39 = vector.extract_strided_slice %26 {offsets = [24, 0], sizes = [8, 1], strides = [1, 1]} : vector<32x1xf32> to vector<8x1xf32>
      %40 = arith.addf %36, %39 : vector<8x1xf32>
      %cst_21 = arith.constant 0.001953125 : f32
      %41 = vector.broadcast %cst_21 : f32 to vector<8x1xf32>
      %42 = arith.mulf %38, %41 : vector<8x1xf32>
      %cst_22 = arith.constant 0.001953125 : f32
      %43 = vector.broadcast %cst_22 : f32 to vector<8x1xf32>
      %44 = arith.mulf %40, %43 : vector<8x1xf32>
      %45 = arith.mulf %42, %42 : vector<8x1xf32>
      %46 = arith.subf %44, %45 : vector<8x1xf32>
      %cst_23 = arith.constant 9.99999974E-6 : f32
      %47 = vector.broadcast %cst_23 : f32 to vector<8x1xf32>
      %48 = arith.addf %46, %47 : vector<8x1xf32>
      %49 = math.rsqrt %48 : vector<8x1xf32>
      %c0_24 = arith.constant 0 : index
      %c0_25 = arith.constant 0 : index
      %50 = vector.load %arg3[%c0_24, %c0_25] : memref<8x1xf32, #tpu.memory_space<vmem>>, vector<8x1xf32>
      %51 = arith.mulf %49, %50 : vector<8x1xf32>
      %c0_26 = arith.constant 0 : index
      %c0_27 = arith.constant 0 : index
      %52 = vector.load %arg4[%c0_26, %c0_27] : memref<8x1xf32, #tpu.memory_space<vmem>>, vector<8x1xf32>
      %53 = arith.mulf %42, %51 : vector<8x1xf32>
      %54 = arith.subf %52, %53 : vector<8x1xf32>
      %55 = tpu.concatenate %51, %51, %51, %51 in 0 : vector<8x1xf32>, vector<8x1xf32>, vector<8x1xf32>, vector<8x1xf32> -> vector<32x1xf32>
      %56 = tpu.concatenate %54, %54, %54, %54 in 0 : vector<8x1xf32>, vector<8x1xf32>, vector<8x1xf32>, vector<8x1xf32> -> vector<32x1xf32>
      %c0_28 = arith.constant 0 : index
      %c0_29 = arith.constant 0 : index
      %57 = vector.load %arg5[%c0_28, %c0_29] : memref<32x128xbf16, #tpu.memory_space<vmem>>, vector<32x128xbf16>
      %58 = arith.extf %57 : vector<32x128xbf16> to vector<32x128xf32>
      %59 = vector.broadcast %55 : vector<32x1xf32> to vector<32x128xf32>
      %60 = arith.mulf %58, %59 : vector<32x128xf32>
      %61 = vector.broadcast %56 : vector<32x1xf32> to vector<32x128xf32>
      %62 = arith.addf %60, %61 : vector<32x128xf32>
      %cst_30 = arith.constant 0.000000e+00 : f32
      %63 = vector.broadcast %cst_30 : f32 to vector<32x128xf32>
      %64 = arith.subf %63, %62 : vector<32x128xf32>
      %65 = math.exp %64 : vector<32x128xf32>
      %cst_31 = arith.constant 1.000000e+00 : f32
      %66 = vector.broadcast %cst_31 : f32 to vector<32x128xf32>
      %67 = arith.addf %66, %65 : vector<32x128xf32>
      %68 = tpu.reciprocal %67 {approx = true} : vector<32x128xf32> -> vector<32x128xf32>
      %69 = arith.mulf %62, %68 : vector<32x128xf32>
      %70 = arith.truncf %69 : vector<32x128xf32> to vector<32x128xbf16>
      %c0_32 = arith.constant 0 : index
      %c0_33 = arith.constant 0 : index
      %71 = vector.load %arg5[%c0_32, %c0_33] : memref<32x128xbf16, #tpu.memory_space<vmem>>, vector<32x128xbf16>
      tpu.vector_store %arg5[%c0_32, %c0_33], %70 {strides = array<i32>} : memref<32x128xbf16, #tpu.memory_space<vmem>>, vector<32x128xbf16>,
    } else {
    }
    return
  }
  func.func @transform_0(%arg0: i32) -> (i32, i32) {
    %c0_i32 = arith.constant 0 : i32
    %c0_i32_0 = arith.constant 0 : i32
    %c0_i32_1 = arith.constant 0 : i32
    return %c0_i32, %c0_i32_0 : i32, i32
  }
  func.func @transform_1(%arg0: i32) -> (i32, i32) {
    %c0_i32 = arith.constant 0 : i32
    %c0_i32_0 = arith.constant 0 : i32
    return %c0_i32, %arg0 : i32, i32
  }
  func.func @transform_2(%arg0: i32) -> (i32, i32) {
    %c0_i32 = arith.constant 0 : i32
    %c0_i32_0 = arith.constant 0 : i32
    %c0_i32_1 = arith.constant 0 : i32
    return %c0_i32, %c0_i32_0 : i32, i32
  }
  func.func @transform_3(%arg0: i32) -> (i32, i32) {
    %c0_i32 = arith.constant 0 : i32
    %c0_i32_0 = arith.constant 0 : i32
    %c0_i32_1 = arith.constant 0 : i32
    return %c0_i32, %c0_i32_0 : i32, i32
  }
  func.func @transform_4(%arg0: i32) -> (i32, i32) {
    %c0_i32 = arith.constant 0 : i32
    %c0_i32_0 = arith.constant 0 : i32
    %c0_i32_1 = arith.constant 0 : i32
    return %c0_i32, %c0_i32_0 : i32, i32
  }
}

module attributes {stable_mosaic.version = 11 : i64} {
  func.func @_fused_conv_bn_act_kernel(%arg0: i32, %arg1: memref<32x112xbf16, #tpu.memory_space<vmem>>, %arg2: memref<112x512xbf16, #tpu.memory_space<vmem>>, %arg3: memref<8x1xf32, #tpu.memory_space<vmem>>, %arg4: memref<8x1xf32, #tpu.memory_space<vmem>>, %arg5: memref<32x512xbf16, #tpu.memory_space<vmem>>, %arg6: memref<32x1xf32, #tpu.memory_space<vmem>>, %arg7: memref<32x1xf32, #tpu.memory_space<vmem>>) attributes {dimension_semantics = [#tpu.dimension_semantics<arbitrary>], iteration_bounds = array<i64: 1>, scalar_prefetch = 0 : i64, scratch_operands = 2 : i64, tpu.core_type = #tpu.core_type<tc>, window_params = [{pipeline_mode = #tpu.pipeline_mode<synchronous>, transform_indices = @transform_0, window_bounds = array<i64: 32, 112>}, {transform_indices = @transform_1, window_bounds = array<i64: 112, 512>}, {pipeline_mode = #tpu.pipeline_mode<synchronous>, transform_indices = @transform_2, window_bounds = array<i64: 8, 1>}, {pipeline_mode = #tpu.pipeline_mode<synchronous>, transform_indices = @transform_3, window_bounds = array<i64: 8, 1>}, {pipeline_mode = #tpu.pipeline_mode<synchronous>, transform_indices = @transform_4, window_bounds = array<i64: 32, 512>}]} {
    %c0_i32 = arith.constant 0 : i32
    %0 = arith.cmpi eq, %arg0, %c0_i32 : i32
    %1 = arith.extui %0 : i1 to i32
    %c0_i32_0 = arith.constant 0 : i32
    %2 = arith.cmpi ne, %1, %c0_i32_0 : i32
    scf.if %2 {
      %cst_17 = arith.constant 0.000000e+00 : f32
      %25 = vector.broadcast %cst_17 : f32 to vector<32x1xf32>
      %c0_18 = arith.constant 0 : index
      %c0_19 = arith.constant 0 : index
      %26 = vector.load %arg6[%c0_18, %c0_19] : memref<32x1xf32, #tpu.memory_space<vmem>>, vector<32x1xf32>
      tpu.vector_store %arg6[%c0_18, %c0_19], %25 {strides = array<i32>} : memref<32x1xf32, #tpu.memory_space<vmem>>, vector<32x1xf32>,
      %cst_20 = arith.constant 0.000000e+00 : f32
      %27 = vector.broadcast %cst_20 : f32 to vector<32x1xf32>
      %c0_21 = arith.constant 0 : index
      %c0_22 = arith.constant 0 : index
      %28 = vector.load %arg7[%c0_21, %c0_22] : memref<32x1xf32, #tpu.memory_space<vmem>>, vector<32x1xf32>
      tpu.vector_store %arg7[%c0_21, %c0_22], %27 {strides = array<i32>} : memref<32x1xf32, #tpu.memory_space<vmem>>, vector<32x1xf32>,
    } else {
    }
    %c0 = arith.constant 0 : index
    %c0_1 = arith.constant 0 : index
    %3 = vector.load %arg1[%c0, %c0_1] : memref<32x112xbf16, #tpu.memory_space<vmem>>, vector<32x112xbf16>
    %c0_2 = arith.constant 0 : index
    %c0_3 = arith.constant 0 : index
    %4 = vector.load %arg2[%c0_2, %c0_3] : memref<112x512xbf16, #tpu.memory_space<vmem>>, vector<112x512xbf16>
    %cst = arith.constant dense<0.000000e+00> : vector<32x512xf32>
    %5 = tpu.matmul %3, %4, %cst {dimension_numbers = #tpu.dot_dimension_numbers<[1], [0], [0], [1], [0, 0, 1, 1], [], []>} : vector<32x112xbf16>, vector<112x512xbf16>, vector<32x512xf32> -> vector<32x512xf32>
    %c0_4 = arith.constant 0 : index
    %c0_5 = arith.constant 0 : index
    %6 = vector.load %arg6[%c0_4, %c0_5] : memref<32x1xf32, #tpu.memory_space<vmem>>, vector<32x1xf32>
    %cst_6 = arith.constant dense<0.000000e+00> : vector<32xf32>
    %7 = vector.multi_reduction <add>, %5, %cst_6 [1] : vector<32x512xf32> to vector<32xf32>
    %8 = vector.shape_cast %7 : vector<32xf32> to vector<32x1xf32>
    %9 = arith.addf %6, %8 : vector<32x1xf32>
    %c0_7 = arith.constant 0 : index
    %c0_8 = arith.constant 0 : index
    %10 = vector.load %arg6[%c0_7, %c0_8] : memref<32x1xf32, #tpu.memory_space<vmem>>, vector<32x1xf32>
    tpu.vector_store %arg6[%c0_7, %c0_8], %9 {strides = array<i32>} : memref<32x1xf32, #tpu.memory_space<vmem>>, vector<32x1xf32>,
    %c0_9 = arith.constant 0 : index
    %c0_10 = arith.constant 0 : index
    %11 = vector.load %arg7[%c0_9, %c0_10] : memref<32x1xf32, #tpu.memory_space<vmem>>, vector<32x1xf32>
    %12 = arith.mulf %5, %5 : vector<32x512xf32>
    %cst_11 = arith.constant dense<0.000000e+00> : vector<32xf32>
    %13 = vector.multi_reduction <add>, %12, %cst_11 [1] : vector<32x512xf32> to vector<32xf32>
    %14 = vector.shape_cast %13 : vector<32xf32> to vector<32x1xf32>
    %15 = arith.addf %11, %14 : vector<32x1xf32>
    %c0_12 = arith.constant 0 : index
    %c0_13 = arith.constant 0 : index
    %16 = vector.load %arg7[%c0_12, %c0_13] : memref<32x1xf32, #tpu.memory_space<vmem>>, vector<32x1xf32>
    tpu.vector_store %arg7[%c0_12, %c0_13], %15 {strides = array<i32>} : memref<32x1xf32, #tpu.memory_space<vmem>>, vector<32x1xf32>,
    %c512_i32 = arith.constant 512 : i32
    %17 = arith.muli %arg0, %c512_i32 : i32
    %18 = tpu.assume_multiple %17, 128 : i32
    %19 = arith.truncf %5 : vector<32x512xf32> to vector<32x512xbf16>
    %c0_14 = arith.constant 0 : index
    %20 = arith.index_cast %18 : i32 to index
    %21 = vector.load %arg5[%c0_14, %20] : memref<32x512xbf16, #tpu.memory_space<vmem>>, vector<32x512xbf16>
    tpu.vector_store %arg5[%c0_14, %20], %19 {strides = array<i32>} : memref<32x512xbf16, #tpu.memory_space<vmem>>, vector<32x512xbf16>,
    %c0_i32_15 = arith.constant 0 : i32
    %22 = arith.cmpi eq, %arg0, %c0_i32_15 : i32
    %23 = arith.extui %22 : i1 to i32
    %c0_i32_16 = arith.constant 0 : i32
    %24 = arith.cmpi ne, %23, %c0_i32_16 : i32
    scf.if %24 {
      %c0_17 = arith.constant 0 : index
      %c0_18 = arith.constant 0 : index
      %25 = vector.load %arg6[%c0_17, %c0_18] : memref<32x1xf32, #tpu.memory_space<vmem>>, vector<32x1xf32>
      %c0_19 = arith.constant 0 : index
      %c0_20 = arith.constant 0 : index
      %26 = vector.load %arg7[%c0_19, %c0_20] : memref<32x1xf32, #tpu.memory_space<vmem>>, vector<32x1xf32>
      %27 = vector.extract_strided_slice %25 {offsets = [0, 0], sizes = [8, 1], strides = [1, 1]} : vector<32x1xf32> to vector<8x1xf32>
      %28 = vector.extract_strided_slice %26 {offsets = [0, 0], sizes = [8, 1], strides = [1, 1]} : vector<32x1xf32> to vector<8x1xf32>
      %29 = vector.extract_strided_slice %25 {offsets = [8, 0], sizes = [8, 1], strides = [1, 1]} : vector<32x1xf32> to vector<8x1xf32>
      %30 = arith.addf %27, %29 : vector<8x1xf32>
      %31 = vector.extract_strided_slice %26 {offsets = [8, 0], sizes = [8, 1], strides = [1, 1]} : vector<32x1xf32> to vector<8x1xf32>
      %32 = arith.addf %28, %31 : vector<8x1xf32>
      %33 = vector.extract_strided_slice %25 {offsets = [16, 0], sizes = [8, 1], strides = [1, 1]} : vector<32x1xf32> to vector<8x1xf32>
      %34 = arith.addf %30, %33 : vector<8x1xf32>
      %35 = vector.extract_strided_slice %26 {offsets = [16, 0], sizes = [8, 1], strides = [1, 1]} : vector<32x1xf32> to vector<8x1xf32>
      %36 = arith.addf %32, %35 : vector<8x1xf32>
      %37 = vector.extract_strided_slice %25 {offsets = [24, 0], sizes = [8, 1], strides = [1, 1]} : vector<32x1xf32> to vector<8x1xf32>
      %38 = arith.addf %34, %37 : vector<8x1xf32>
      %39 = vector.extract_strided_slice %26 {offsets = [24, 0], sizes = [8, 1], strides = [1, 1]} : vector<32x1xf32> to vector<8x1xf32>
      %40 = arith.addf %36, %39 : vector<8x1xf32>
      %cst_21 = arith.constant 4.8828125E-4 : f32
      %41 = vector.broadcast %cst_21 : f32 to vector<8x1xf32>
      %42 = arith.mulf %38, %41 : vector<8x1xf32>
      %cst_22 = arith.constant 4.8828125E-4 : f32
      %43 = vector.broadcast %cst_22 : f32 to vector<8x1xf32>
      %44 = arith.mulf %40, %43 : vector<8x1xf32>
      %45 = arith.mulf %42, %42 : vector<8x1xf32>
      %46 = arith.subf %44, %45 : vector<8x1xf32>
      %cst_23 = arith.constant 9.99999974E-6 : f32
      %47 = vector.broadcast %cst_23 : f32 to vector<8x1xf32>
      %48 = arith.addf %46, %47 : vector<8x1xf32>
      %49 = math.rsqrt %48 : vector<8x1xf32>
      %c0_24 = arith.constant 0 : index
      %c0_25 = arith.constant 0 : index
      %50 = vector.load %arg3[%c0_24, %c0_25] : memref<8x1xf32, #tpu.memory_space<vmem>>, vector<8x1xf32>
      %51 = arith.mulf %49, %50 : vector<8x1xf32>
      %c0_26 = arith.constant 0 : index
      %c0_27 = arith.constant 0 : index
      %52 = vector.load %arg4[%c0_26, %c0_27] : memref<8x1xf32, #tpu.memory_space<vmem>>, vector<8x1xf32>
      %53 = arith.mulf %42, %51 : vector<8x1xf32>
      %54 = arith.subf %52, %53 : vector<8x1xf32>
      %55 = tpu.concatenate %51, %51, %51, %51 in 0 : vector<8x1xf32>, vector<8x1xf32>, vector<8x1xf32>, vector<8x1xf32> -> vector<32x1xf32>
      %56 = tpu.concatenate %54, %54, %54, %54 in 0 : vector<8x1xf32>, vector<8x1xf32>, vector<8x1xf32>, vector<8x1xf32> -> vector<32x1xf32>
      %c0_28 = arith.constant 0 : index
      %c0_29 = arith.constant 0 : index
      %57 = vector.load %arg5[%c0_28, %c0_29] : memref<32x512xbf16, #tpu.memory_space<vmem>>, vector<32x512xbf16>
      %58 = arith.extf %57 : vector<32x512xbf16> to vector<32x512xf32>
      %59 = vector.broadcast %55 : vector<32x1xf32> to vector<32x512xf32>
      %60 = arith.mulf %58, %59 : vector<32x512xf32>
      %61 = vector.broadcast %56 : vector<32x1xf32> to vector<32x512xf32>
      %62 = arith.addf %60, %61 : vector<32x512xf32>
      %cst_30 = arith.constant 0.000000e+00 : f32
      %63 = vector.broadcast %cst_30 : f32 to vector<32x512xf32>
      %64 = arith.subf %63, %62 : vector<32x512xf32>
      %65 = math.exp %64 : vector<32x512xf32>
      %cst_31 = arith.constant 1.000000e+00 : f32
      %66 = vector.broadcast %cst_31 : f32 to vector<32x512xf32>
      %67 = arith.addf %66, %65 : vector<32x512xf32>
      %68 = tpu.reciprocal %67 {approx = true} : vector<32x512xf32> -> vector<32x512xf32>
      %69 = arith.mulf %62, %68 : vector<32x512xf32>
      %70 = arith.truncf %69 : vector<32x512xf32> to vector<32x512xbf16>
      %c0_32 = arith.constant 0 : index
      %c0_33 = arith.constant 0 : index
      %71 = vector.load %arg5[%c0_32, %c0_33] : memref<32x512xbf16, #tpu.memory_space<vmem>>, vector<32x512xbf16>
      tpu.vector_store %arg5[%c0_32, %c0_33], %70 {strides = array<i32>} : memref<32x512xbf16, #tpu.memory_space<vmem>>, vector<32x512xbf16>,
    } else {
    }
    return
  }
  func.func @transform_0(%arg0: i32) -> (i32, i32) {
    %c0_i32 = arith.constant 0 : i32
    %c0_i32_0 = arith.constant 0 : i32
    %c0_i32_1 = arith.constant 0 : i32
    return %c0_i32, %c0_i32_0 : i32, i32
  }
  func.func @transform_1(%arg0: i32) -> (i32, i32) {
    %c0_i32 = arith.constant 0 : i32
    %c0_i32_0 = arith.constant 0 : i32
    return %c0_i32, %arg0 : i32, i32
  }
  func.func @transform_2(%arg0: i32) -> (i32, i32) {
    %c0_i32 = arith.constant 0 : i32
    %c0_i32_0 = arith.constant 0 : i32
    %c0_i32_1 = arith.constant 0 : i32
    return %c0_i32, %c0_i32_0 : i32, i32
  }
  func.func @transform_3(%arg0: i32) -> (i32, i32) {
    %c0_i32 = arith.constant 0 : i32
    %c0_i32_0 = arith.constant 0 : i32
    %c0_i32_1 = arith.constant 0 : i32
    return %c0_i32, %c0_i32_0 : i32, i32
  }
  func.func @transform_4(%arg0: i32) -> (i32, i32) {
    %c0_i32 = arith.constant 0 : i32
    %c0_i32_0 = arith.constant 0 : i32
    %c0_i32_1 = arith.constant 0 : i32
    return %c0_i32, %c0_i32_0 : i32, i32
  }
}

</mosaic_0001>

<bundles_post_ra>
// kernel: conv_transpose_block2d_forward.3
= control target key start
LH: loop header
LB: loop body
LE: loop exit
PB: predicated region body
PF: predicated region fallthrough
CT: control target
= control target key end

     0   :  { %v202_v0 = vmov 0.0   ;;  %vm203_vm0 = vmmov 0   ;;  %vm58_vm1 = vcmask 523264   ;;  %vm22_vm2 = vcmask 7168   ;;  %s264_s1 = inlined_call_operand.vmem [shape: bf16[64,128], index: 1, kind: input, shape index: {}]   ;;  %s265_s0 = inlined_call_operand.vmem [shape: bf16[8,64], index: 0, kind: input, shape index: {}]   ;;  %s266_s4 = inlined_call_operand.vmem [shape: bf16[8,128], index: 4, kind: output, shape index: {}]   ;;  %s267_s2 = inlined_call_operand.vmem [shape: f32[8,1], index: 2, kind: input, shape index: {}]   ;;  %s268_s3 = inlined_call_operand.vmem [shape: f32[8,1], index: 3, kind: input, shape index: {}]  }
   0x1   :  { %175 = vmatprep.subr.bf16.mxu0 %v202_v0  ;;  %v192_v1 = vld [vmem:[%s264_s1] sm:$0xff]   ;;  %183 = vmatprep.mubr.msk.bf16.mxu0 %vm203_vm0, %v202_v0  ;;  %v193_v2 = vld [vmem:[%s264_s1 + $0x8] sm:$0xff]   ;;  %v194_v3 = vld [vmem:[%s264_s1 + $0x10] sm:$0xff]   ;;  %23 = vst.msk [vmem:[#allocation2] sm:$0xff] %vm22_vm2, %v202_v0  ;;  %v204_v12 = vmov 0  }
   0x2   :  { %176 = vmatpush3.bf16.msra.mxu0 %v192_v1  ;;  %v195_v4 = vld [vmem:[%s264_s1 + $0x18] sm:$0xff]   ;;  %v25_v5 = vld [vmem:[%s265_s0] sm:$0xf]  ;;  %24 = vst.msk [vmem:[#allocation3] sm:$0xff] %vm22_vm2, %v202_v0  ;;  %190 = vset.pattern.permute.xlu1 %v204_v12 }
   0x3   :  { %177 = vmatprep.subr.bf16.mxu0 %v202_v0  ;;  %191 = vset.pattern.permute.xlu0 %v204_v12  ;;  %v132_v26 = vld [vmem:[%s267_s2] sm:$0xff] }
   0x4   :  { %v134_v29 = vld [vmem:[%s268_s3] sm:$0xff] }
   0x6   :  { %178 = vmatpush3.bf16.msra.mxu0 %v193_v2 }
   0x7   :  { %179 = vmatprep.subr.bf16.mxu0 %v202_v0 }
   0x8   :  { %v102_v13 = vld [vmem:[#allocation2] sm:$0xff] }
   0x9   :  { %v108_v16 = vld [vmem:[#allocation3] sm:$0xff] }
   0xa   :  { %180 = vmatpush3.bf16.msra.mxu0 %v194_v3 }
   0xb   :  { %181 = vmatprep.subr.bf16.mxu0 %v202_v0 }
   0xe   :  { %182 = vmatpush3.bf16.msra.mxu0 %v195_v4 }
  0x11   :  { %184 = vmatmul.mubr.msk.bf16.vlgmr.msra.gmra.mrb[0].mxu0 %vm58_vm1, %v25_v5 }
  0xe4   :  { %v96_v6 = vpop.f32.mrb[0].mxu0 }
  0xe5   :  { %v115_v7 = vpack.c.bf16 %v96_v6, %v96_v6  ;;  %103 = vadd.xlane.f32.xlu0 %v96_v6  ;;  %v185_v8 = vpop.f32.mrb[1].mxu0  ;;  %v109_v11 = vmul.f32 %v96_v6, %v96_v6 }
  0xe6   :  { %v99_v9 = vpop.f32.mrb[2].mxu0 }
  0xe7   :  { %120 = vst [vmem:[%s266_s4] sm:$0xf] %v115_v7  ;;  %v186_v10 = vpop.f32.mrb[3].mxu0 }
  0xe9   :  { %110 = vadd.xlane.f32.xlu0 %v109_v11 }
  0xee   :  { %v137_v32 = vld [vmem:[%s266_s4] sm:$0xf] }
  0xef   :  { %v138_v34 = vunpack.c.l.bf16 %v137_v32 }
 0x172   :  { %v104_v14 = vpop.xlane.xlu0 %103 }
 0x173   :  { %v105_v15 = vadd.f32 %v104_v14, %v102_v13 }
 0x175   :  { %107 = vst.msk [vmem:[#allocation2] sm:$0xff] %vm22_vm2, %v105_v15 }
 0x176   :  { %v111_v17 = vpop.xlane.xlu0 %110 }
 0x177   :  { %v112_v18 = vadd.f32 %v111_v17, %v108_v16 }
 0x179   :  { %113 = vst.msk [vmem:[#allocation3] sm:$0xff] %vm22_vm2, %v112_v18 }
 0x17c   :  { %v124_v19 = vld [vmem:[#allocation2] sm:$0xff] }
 0x17d   :  { %v126_v20 = vmul.f32 0.0078125, %v124_v19 }
 0x17f   :  { %v128_v23 = vmul.f32 %v126_v20, %v126_v20 }
 0x180   :  { %v125_v21 = vld [vmem:[#allocation3] sm:$0xff] }
 0x181   :  { %v127_v22 = vmul.f32 0.0078125, %v125_v21 }
 0x183   :  { %v129_v24 = vsub.f32 %v127_v22, %v128_v23 }
 0x185   :  { %v130_v25 = vadd.f32 1e-05, %v129_v24 }
 0x187   :  { %196 = vrsqrt.f32 %v130_v25 }
 0x191   :  { %v197_v27 = vpop.eup %196 }
 0x192   :  { %v133_v28 = vmul.f32 %v197_v27, %v132_v26 }
 0x194   :  { %141 = vperm.xlu1 %190, %v133_v28   ;;  %v135_v30 = vmul.f32 %v133_v28, %v126_v20 }
 0x196   :  { %v136_v31 = vsub.f32 %v134_v29, %v135_v30 }
 0x198   :  { %147 = vperm.xlu1 %190, %v136_v31  }
 0x213   :  { %v142_v33 = vpop.permute.xlu1 %141 }
 0x214   :  { %v144_v35 = vmul.f32 %v142_v33, %v138_v34 }
 0x217   :  { %v148_v36 = vpop.permute.xlu1 %147 }
 0x218   :  { %v150_v37 = vadd.f32 %v148_v36, %v144_v35 }
 0x21a   :  { %v151_v38 = vsub.f32 0.0, %v150_v37 }
 0x21c   :  { %v152_v39 = vmul.f32 1.442695, %v151_v38 }
 0x21e   :  { %198 = vpow2.f32 %v152_v39 }
 0x228   :  { %v199_v40 = vpop.eup %198 }
 0x229   :  { %v154_v41 = vadd.f32 1.0, %v199_v40 }
 0x22b   :  { %200 = vrcp.f32 %v154_v41 }
 0x235   :  { %v201_v42 = vpop.eup %200 }
 0x236   :  { %v156_v43 = vmul.f32 %v201_v42, %v150_v37 }
 0x238   :  { %v157_v44 = vpack.c.bf16 %v156_v43, %v156_v43 }
 0x23a   :  { %158 = vst [vmem:[%s266_s4] sm:$0xf] %v157_v44 }

// kernel: conv_transpose_block2d_forward.4
= control target key start
LH: loop header
LB: loop body
LE: loop exit
PB: predicated region body
PF: predicated region fallthrough
CT: control target
= control target key end

     0   :  { %vm85_vm0 = vcmask 654336   ;;  %vm22_vm1 = vcmask 7168   ;;  %v421_v7 = vmov 0.0   ;;  %v422_v18 = vmov 0   ;;  %s505_s1 = inlined_call_operand.vmem [shape: bf16[80,128], index: 1, kind: input, shape index: {}]   ;;  %s506_s0 = inlined_call_operand.vmem [shape: bf16[32,80], index: 0, kind: input, shape index: {}]   ;;  %s507_s2 = inlined_call_operand.vmem [shape: f32[8,1], index: 2, kind: input, shape index: {}]   ;;  %s508_s3 = inlined_call_operand.vmem [shape: f32[8,1], index: 3, kind: input, shape index: {}]   ;;  %s509_s4 = inlined_call_operand.vmem [shape: bf16[32,128], index: 4, kind: output, shape index: {}]  }
   0x1   :  { %v396_v0 = vld [vmem:[%s505_s1] sm:$0xff]   ;;  %v397_v1 = vld [vmem:[%s505_s1 + $0x8] sm:$0xff]   ;;  %v398_v2 = vld [vmem:[%s505_s1 + $0x10] sm:$0xff]   ;;  %25 = vst.msk [vmem:[#allocation2 + $0x10] sm:$0xff] %vm22_vm1, %v421_v7  ;;  %394 = vset.pattern.permute.xlu0 %v422_v18  ;;  %395 = vset.pattern.permute.xlu1 %v422_v18 }
   0x2   :  { %378 = vmatprep.subr.bf16.mxu0 %v396_v0  ;;  %v401_v3 = vld [vmem:[%s506_s0] sm:$0xff]   ;;  %v399_v4 = vld [vmem:[%s505_s1 + $0x18] sm:$0xff]   ;;  %v402_v6 = vld [vmem:[%s506_s0 + $0x8] sm:$0xff]   ;;  %23 = vst.msk [vmem:[#allocation2] sm:$0xff] %vm22_vm1, %v421_v7 }
   0x3   :  { %379 = vmatpush3.bf16.msra.mxu0 %v396_v0  ;;  %388 = vmatprep.mubr.msk.bf16.mxu0 %vm85_vm0, %v401_v3  ;;  %v400_v5 = vld [vmem:[%s505_s1 + $0x20] sm:$0xff]   ;;  %24 = vst.msk [vmem:[#allocation2 + $0x8] sm:$0xff] %vm22_vm1, %v421_v7  ;;  %26 = vst.msk [vmem:[#allocation2 + $0x18] sm:$0xff] %vm22_vm1, %v421_v7 }
   0x4   :  { %380 = vmatprep.subr.bf16.mxu0 %v397_v1  ;;  %27 = vst.msk [vmem:[#allocation3] sm:$0xff] %vm22_vm1, %v421_v7  ;;  %28 = vst.msk [vmem:[#allocation3 + $0x8] sm:$0xff] %vm22_vm1, %v421_v7  ;;  %v234_v62 = vld [vmem:[%s507_s2] sm:$0xff] }
   0x5   :  { %29 = vst.msk [vmem:[#allocation3 + $0x10] sm:$0xff] %vm22_vm1, %v421_v7  ;;  %30 = vst.msk [vmem:[#allocation3 + $0x18] sm:$0xff] %vm22_vm1, %v421_v7 }
   0x7   :  { %381 = vmatpush3.bf16.msra.mxu0 %v397_v1  ;;  %v236_v1 = vld [vmem:[%s508_s3] sm:$0xff] }
   0x8   :  { %382 = vmatprep.subr.bf16.mxu0 %v398_v2  ;;  %v143_v19 = vld [vmem:[#allocation2 + $0x10] sm:$0xff] }
   0x9   :  { %v141_v20 = vld [vmem:[#allocation2] sm:$0xff] }
   0xa   :  { %v144_v25 = vld [vmem:[#allocation2 + $0x18] sm:$0xff]  ;;  %v142_v26 = vld [vmem:[#allocation2 + $0x8] sm:$0xff] }
   0xb   :  { %383 = vmatpush3.bf16.msra.mxu0 %v398_v2  ;;  %v162_v31 = vld [vmem:[#allocation3] sm:$0xff]  ;;  %v163_v32 = vld [vmem:[#allocation3 + $0x8] sm:$0xff] }
   0xc   :  { %384 = vmatprep.subr.bf16.mxu0 %v399_v4  ;;  %v165_v37 = vld [vmem:[#allocation3 + $0x18] sm:$0xff]  ;;  %v164_v38 = vld [vmem:[#allocation3 + $0x10] sm:$0xff] }
   0xf   :  { %385 = vmatpush3.bf16.msra.mxu0 %v399_v4 }
  0x10   :  { %386 = vmatprep.subr.bf16.mxu0 %v400_v5 }
  0x13   :  { %387 = vmatpush3.bf16.msra.mxu0 %v400_v5 }
  0x16   :  { %389 = vmatmul.mubr.msk.bf16.vlgmr.msra.gmra.mrb[0].mxu0 %vm85_vm0, %v402_v6 }
  0xe9   :  { %v390_v8 = vpop.f32.mrb[0].mxu0 }
  0xea   :  { %149 = vadd.xlane.f32.xlu1 %v390_v8  ;;  %v126_v9 = vpop.f32.mrb[1].mxu0  ;;  %v168_v17 = vmul.f32 %v390_v8, %v390_v8 }
  0xeb   :  { %145 = vadd.xlane.f32.xlu0 %v126_v9  ;;  %v391_v10 = vpop.f32.mrb[2].mxu0  ;;  %v166_v14 = vmul.f32 %v126_v9, %v126_v9 }
  0xec   :  { %v477_v11 = vpack.c.bf16 %v391_v10, %v390_v8  ;;  %v129_v12 = vpop.f32.mrb[3].mxu0  ;;  %v169_v16 = vmul.f32 %v391_v10, %v391_v10 }
  0xed   :  { %v479_v13 = vpack.c.bf16 %v129_v12, %v126_v9  ;;  %v167_v15 = vmul.f32 %v129_v12, %v129_v12 }
  0xee   :  { %151 = vadd.xlane.f32.xlu1 %v391_v10  ;;  %v356_v7 = vunpack.c.l.bf16 %v477_v11  ;;  %v357_v8 = vunpack.c.h.bf16 %v477_v11 }
  0xef   :  { %147 = vadd.xlane.f32.xlu0 %v129_v12  ;;  %v352_v5 = vunpack.c.l.bf16 %v479_v13  ;;  %v353_v6 = vunpack.c.h.bf16 %v479_v13 }
  0xf2   :  { %170 = vadd.xlane.f32.xlu1 %v166_v14 }
  0xf3   :  { %172 = vadd.xlane.f32.xlu0 %v167_v15 }
  0xf6   :  { %176 = vadd.xlane.f32.xlu1 %v169_v16 }
  0xf7   :  { %174 = vadd.xlane.f32.xlu0 %v168_v17 }
 0x177   :  { %v150_v21 = vpop.xlane.xlu1 %149 }
 0x178   :  { %v155_v22 = vadd.f32 %v150_v21, %v143_v19  ;;  %v146_v23 = vpop.xlane.xlu0 %145 }
 0x179   :  { %v153_v24 = vadd.f32 %v146_v23, %v141_v20 }
 0x17a   :  { %160 = vst.msk [vmem:[#allocation2 + $0x10] sm:$0xff] %vm22_vm1, %v155_v22 }
 0x17b   :  { %158 = vst.msk [vmem:[#allocation2] sm:$0xff] %vm22_vm1, %v153_v24  ;;  %v152_v27 = vpop.xlane.xlu1 %151 }
 0x17c   :  { %v156_v28 = vadd.f32 %v152_v27, %v144_v25  ;;  %v148_v29 = vpop.xlane.xlu0 %147 }
 0x17d   :  { %v154_v30 = vadd.f32 %v148_v29, %v142_v26 }
 0x17e   :  { %161 = vst.msk [vmem:[#allocation2 + $0x18] sm:$0xff] %vm22_vm1, %v156_v28 }
 0x17f   :  { %159 = vst.msk [vmem:[#allocation2 + $0x8] sm:$0xff] %vm22_vm1, %v154_v30  ;;  %v171_v33 = vpop.xlane.xlu1 %170 }
 0x180   :  { %v178_v34 = vadd.f32 %v171_v33, %v162_v31  ;;  %v173_v35 = vpop.xlane.xlu0 %172 }
 0x181   :  { %v179_v36 = vadd.f32 %v173_v35, %v163_v32  ;;  %v216_v46 = vld [vmem:[#allocation2 + $0x10] sm:$0xff] }
 0x182   :  { %182 = vst.msk [vmem:[#allocation3] sm:$0xff] %vm22_vm1, %v178_v34  ;;  %v214_v43 = vld [vmem:[#allocation2] sm:$0xff] }
 0x183   :  { %183 = vst.msk [vmem:[#allocation3 + $0x8] sm:$0xff] %vm22_vm1, %v179_v36  ;;  %v177_v39 = vpop.xlane.xlu1 %176 }
 0x184   :  { %v181_v40 = vadd.f32 %v177_v39, %v165_v37  ;;  %v175_v41 = vpop.xlane.xlu0 %174 }
 0x185   :  { %v180_v42 = vadd.f32 %v175_v41, %v164_v38  ;;  %v217_v48 = vld [vmem:[#allocation2 + $0x18] sm:$0xff] }
 0x186   :  { %185 = vst.msk [vmem:[#allocation3 + $0x18] sm:$0xff] %vm22_vm1, %v181_v40  ;;  %v215_v44 = vld [vmem:[#allocation2 + $0x8] sm:$0xff] }
 0x187   :  { %184 = vst.msk [vmem:[#allocation3 + $0x10] sm:$0xff] %vm22_vm1, %v180_v42  ;;  %v222_v45 = vadd.f32 %v215_v44, %v214_v43 }
 0x189   :  { %v224_v47 = vadd.f32 %v222_v45, %v216_v46  ;;  %v218_v49 = vld [vmem:[#allocation3] sm:$0xff] }
 0x18a   :  { %v219_v50 = vld [vmem:[#allocation3 + $0x8] sm:$0xff] }
 0x18b   :  { %v226_v51 = vadd.f32 %v224_v47, %v217_v48  ;;  %v223_v52 = vadd.f32 %v219_v50, %v218_v49 }
 0x18d   :  { %v228_v55 = vmul.f32 0.001953125, %v226_v51  ;;  %v221_v56 = vld [vmem:[#allocation3 + $0x18] sm:$0xff] }
 0x18e   :  { %v220_v53 = vld [vmem:[#allocation3 + $0x10] sm:$0xff] }
 0x18f   :  { %v225_v54 = vadd.f32 %v223_v52, %v220_v53  ;;  %v230_v59 = vmul.f32 %v228_v55, %v228_v55 }
 0x191   :  { %v227_v57 = vadd.f32 %v225_v54, %v221_v56 }
 0x193   :  { %v229_v58 = vmul.f32 0.001953125, %v227_v57 }
 0x195   :  { %v231_v60 = vsub.f32 %v229_v58, %v230_v59 }
 0x197   :  { %v232_v61 = vadd.f32 1e-05, %v231_v60 }
 0x199   :  { %403 = vrsqrt.f32 %v232_v61 }
 0x1a3   :  { %v404_v63 = vpop.eup %403 }
 0x1a4   :  { %v235_v0 = vmul.f32 %v404_v63, %v234_v62 }
 0x1a6   :  { %249 = vperm.xlu0 %394, %v235_v0   ;;  %v237_v2 = vmul.f32 %v235_v0, %v228_v55 }
 0x1a8   :  { %v238_v3 = vsub.f32 %v236_v1, %v237_v2 }
 0x1aa   :  { %258 = vperm.xlu1 %395, %v238_v3  }
 0x225   :  { %v250_v4 = vpop.permute.xlu0 %249 }
 0x226   :  { %v252_v9 = vmul.f32 %v352_v5, %v250_v4  ;;  %v253_v10 = vmul.f32 %v353_v6, %v250_v4  ;;  %v254_v12 = vmul.f32 %v356_v7, %v250_v4  ;;  %v255_v14 = vmul.f32 %v357_v8, %v250_v4 }
 0x229   :  { %v259_v15 = vpop.permute.xlu1 %258 }
 0x22a   :  { %v261_v16 = vadd.f32 %v259_v15, %v252_v9  ;;  %v262_v17 = vadd.f32 %v259_v15, %v253_v10  ;;  %v263_v18 = vadd.f32 %v259_v15, %v254_v12  ;;  %v264_v19 = vadd.f32 %v259_v15, %v255_v14 }
 0x22c   :  { %v265_v20 = vsub.f32 0.0, %v261_v16  ;;  %v266_v21 = vsub.f32 0.0, %v262_v17  ;;  %v267_v22 = vsub.f32 0.0, %v263_v18  ;;  %v268_v23 = vsub.f32 0.0, %v264_v19 }
 0x22e   :  { %v269_v24 = vmul.f32 1.442695, %v265_v20  ;;  %v271_v25 = vmul.f32 1.442695, %v266_v21  ;;  %v273_v13 = vmul.f32 1.442695, %v267_v22 }
 0x22f   :  { %v275_v26 = vmul.f32 1.442695, %v268_v23 }
 0x230   :  { %405 = vpow2.f32 %v269_v24 }
 0x231   :  { %407 = vpow2.f32 %v271_v25 }
 0x232   :  { %409 = vpow2.f32 %v273_v13 }
 0x233   :  { %411 = vpow2.f32 %v275_v26 }
 0x23a   :  { %v406_v11 = vpop.eup %405 }
 0x23b   :  { %v408_v27 = vpop.eup %407  ;;  %v277_v28 = vadd.f32 1.0, %v406_v11 }
 0x23c   :  { %v410_v29 = vpop.eup %409  ;;  %v278_v30 = vadd.f32 1.0, %v408_v27 }
 0x23d   :  { %v412_v31 = vpop.eup %411  ;;  %v279_v32 = vadd.f32 1.0, %v410_v29  ;;  %413 = vrcp.f32 %v277_v28 }
 0x23e   :  { %v280_v33 = vadd.f32 1.0, %v412_v31  ;;  %415 = vrcp.f32 %v278_v30 }
 0x23f   :  { %417 = vrcp.f32 %v279_v32 }
 0x240   :  { %419 = vrcp.f32 %v280_v33 }
 0x247   :  { %v414_v34 = vpop.eup %413 }
 0x248   :  { %v416_v35 = vpop.eup %415  ;;  %v285_v36 = vmul.f32 %v414_v34, %v261_v16 }
 0x249   :  { %v418_v37 = vpop.eup %417  ;;  %v286_v38 = vmul.f32 %v416_v35, %v262_v17 }
 0x24a   :  { %v420_v39 = vpop.eup %419  ;;  %v287_v40 = vmul.f32 %v418_v37, %v263_v18 }
 0x24b   :  { %v288_v41 = vmul.f32 %v420_v39, %v264_v19  ;;  %v361_v42 = vpack.c.bf16 %v286_v38, %v285_v36 }
 0x24d   :  { %362 = vst [vmem:[%s509_s4] sm:$0xff] %v361_v42   ;;  %v366_v43 = vpack.c.bf16 %v288_v41, %v287_v40 }
 0x24f   :  { %370 = vst [vmem:[%s509_s4 + $0x8] sm:$0xff] %v366_v43  }

// kernel: conv_transpose_block2d_forward.5
= control target key start
LH: loop header
LB: loop body
LE: loop exit
PB: predicated region body
PF: predicated region fallthrough
CT: control target
= control target key end

     0   :  { %v900_v1 = vmov 0   ;;  %vm213_vm0 = vcmask 916480   ;;  %vm22_vm1 = vcmask 7168   ;;  %v901_v31 = vmov 0.0   ;;  %s1165_s1 = inlined_call_operand.vmem [shape: bf16[112,512], index: 1, kind: input, shape index: {}]   ;;  %s1166_s0 = inlined_call_operand.vmem [shape: bf16[32,112], index: 0, kind: input, shape index: {}]   ;;  %s1167_s2 = inlined_call_operand.vmem [shape: f32[8,1], index: 2, kind: input, shape index: {}]   ;;  %s1168_s3 = inlined_call_operand.vmem [shape: f32[8,1], index: 3, kind: input, shape index: {}]   ;;  %s1169_s4 = inlined_call_operand.vmem [shape: bf16[32,512], index: 4, kind: output, shape index: {}]  }
   0x1   :  { %v790_v0 = vld [vmem:[%s1165_s1 + $0x4] ss:$16 sps:$4 sm:$0xff]   ;;  %252 = vmatprep.mubr.bf16.mxu0 %v900_v1  ;;  %305 = vmatprep.mubr.bf16.mxu1 %v900_v1  ;;  %v792_v2 = vld [vmem:[%s1165_s1 + $0xc] ss:$16 sps:$4 sm:$0xff]   ;;  %v794_v3 = vld [vmem:[%s1165_s1] ss:$16 sps:$4 sm:$0xff]  }
   0x2   :  { %788 = vset.pattern.permute.xlu0 %v900_v1  ;;  %789 = vset.pattern.permute.xlu1 %v900_v1  ;;  %v795_v4 = vld [vmem:[%s1165_s1 + $0x8] ss:$16 sps:$4 sm:$0xff]   ;;  %v796_v5 = vld [vmem:[%s1165_s1 + $0x24] ss:$16 sps:$4 sm:$0xff]   ;;  %v798_v6 = vld [vmem:[%s1165_s1 + $0x2c] ss:$16 sps:$4 sm:$0xff]  }
   0x3   :  { %220 = vmatprep.subr.bf16.mxu0 %v790_v0  ;;  %273 = vmatprep.subr.bf16.mxu1 %v792_v2  ;;  %v800_v7 = vld [vmem:[%s1165_s1 + $0x20] ss:$16 sps:$4 sm:$0xff]   ;;  %v801_v8 = vld [vmem:[%s1165_s1 + $0x28] ss:$16 sps:$4 sm:$0xff]   ;;  %v802_v9 = vld [vmem:[%s1165_s1 + $0x44] ss:$16 sps:$4 sm:$0xff]  }
   0x4   :  { %221 = vmatpush1.bf16.msra.mxu0 %v794_v3  ;;  %274 = vmatpush1.bf16.msra.mxu1 %v795_v4  ;;  %v804_v10 = vld [vmem:[%s1165_s1 + $0x4c] ss:$16 sps:$4 sm:$0xff]   ;;  %v806_v11 = vld [vmem:[%s1165_s1 + $0x40] ss:$16 sps:$4 sm:$0xff]   ;;  %v807_v12 = vld [vmem:[%s1165_s1 + $0x48] ss:$16 sps:$4 sm:$0xff]  }
   0x5   :  { %222 = vmatprep.subr.bf16.mxu0 %v796_v5  ;;  %275 = vmatprep.subr.bf16.mxu1 %v798_v6  ;;  %v808_v13 = vld [vmem:[%s1165_s1 + $0x64] ss:$16 sps:$4 sm:$0xff]   ;;  %v810_v14 = vld [vmem:[%s1165_s1 + $0x6c] ss:$16 sps:$4 sm:$0xff]   ;;  %v812_v15 = vld [vmem:[%s1165_s1 + $0x60] ss:$16 sps:$4 sm:$0xff]  }
   0x6   :  { %v813_v16 = vld [vmem:[%s1165_s1 + $0x68] ss:$16 sps:$4 sm:$0xff]   ;;  %v814_v17 = vld [vmem:[%s1165_s1 + $0x84] ss:$16 sps:$4 sm:$0xff]   ;;  %v816_v18 = vld [vmem:[%s1165_s1 + $0x8c] ss:$16 sps:$4 sm:$0xff]  }
   0x7   :  { %v818_v19 = vld [vmem:[%s1165_s1 + $0x80] ss:$16 sps:$4 sm:$0xff]   ;;  %v819_v20 = vld [vmem:[%s1165_s1 + $0x88] ss:$16 sps:$4 sm:$0xff]   ;;  %v820_v21 = vld [vmem:[%s1165_s1 + $0xa4] ss:$16 sps:$4 sm:$0xff]  }
   0x8   :  { %223 = vmatpush1.bf16.msra.mxu0 %v800_v7  ;;  %276 = vmatpush1.bf16.msra.mxu1 %v801_v8  ;;  %v822_v22 = vld [vmem:[%s1165_s1 + $0xac] ss:$16 sps:$4 sm:$0xff]   ;;  %v824_v23 = vld [vmem:[%s1165_s1 + $0xa0] ss:$16 sps:$4 sm:$0xff]   ;;  %v825_v24 = vld [vmem:[%s1165_s1 + $0xa8] ss:$16 sps:$4 sm:$0xff]  }
   0x9   :  { %224 = vmatprep.subr.bf16.mxu0 %v802_v9  ;;  %277 = vmatprep.subr.bf16.mxu1 %v804_v10  ;;  %v826_v25 = vld [vmem:[%s1165_s1 + $0xc4] ss:$16 sps:$4 sm:$0xff]   ;;  %v828_v26 = vld [vmem:[%s1165_s1 + $0xcc] ss:$16 sps:$4 sm:$0xff]   ;;  %v830_v27 = vld [vmem:[%s1165_s1 + $0xc0] ss:$16 sps:$4 sm:$0xff]  }
   0xa   :  { %v831_v28 = vld [vmem:[%s1165_s1 + $0xc8] ss:$16 sps:$4 sm:$0xff]   ;;  %v832_v29 = vld [vmem:[%s1166_s0] sm:$0xff]   ;;  %23 = vst.msk [vmem:[#allocation2] sm:$0xff] %vm22_vm1, %v901_v31  ;;  %24 = vst.msk [vmem:[#allocation2 + $0x8] sm:$0xff] %vm22_vm1, %v901_v31 }
   0xb   :  { %v833_v30 = vld [vmem:[%s1166_s0 + $0x8] sm:$0xff]   ;;  %25 = vst.msk [vmem:[#allocation2 + $0x10] sm:$0xff] %vm22_vm1, %v901_v31  ;;  %26 = vst.msk [vmem:[#allocation2 + $0x18] sm:$0xff] %vm22_vm1, %v901_v31 }
   0xc   :  { %225 = vmatpush1.bf16.msra.mxu0 %v806_v11  ;;  %278 = vmatpush1.bf16.msra.mxu1 %v807_v12  ;;  %27 = vst.msk [vmem:[#allocation3] sm:$0xff] %vm22_vm1, %v901_v31  ;;  %28 = vst.msk [vmem:[#allocation3 + $0x8] sm:$0xff] %vm22_vm1, %v901_v31 }
   0xd   :  { %226 = vmatprep.subr.bf16.mxu0 %v808_v13  ;;  %279 = vmatprep.subr.bf16.mxu1 %v810_v14  ;;  %29 = vst.msk [vmem:[#allocation3 + $0x10] sm:$0xff] %vm22_vm1, %v901_v31  ;;  %30 = vst.msk [vmem:[#allocation3 + $0x18] sm:$0xff] %vm22_vm1, %v901_v31 }
  0x10   :  { %227 = vmatpush1.bf16.msra.mxu0 %v812_v15  ;;  %280 = vmatpush1.bf16.msra.mxu1 %v813_v16 }
  0x11   :  { %228 = vmatprep.subr.bf16.mxu0 %v814_v17  ;;  %281 = vmatprep.subr.bf16.mxu1 %v816_v18 }
  0x14   :  { %229 = vmatpush1.bf16.msra.mxu0 %v818_v19  ;;  %282 = vmatpush1.bf16.msra.mxu1 %v819_v20 }
  0x15   :  { %230 = vmatprep.subr.bf16.mxu0 %v820_v21  ;;  %283 = vmatprep.subr.bf16.mxu1 %v822_v22 }
  0x18   :  { %231 = vmatpush1.bf16.msra.mxu0 %v824_v23  ;;  %284 = vmatpush1.bf16.msra.mxu1 %v825_v24 }
  0x19   :  { %232 = vmatprep.subr.bf16.mxu0 %v826_v25  ;;  %285 = vmatprep.subr.bf16.mxu1 %v828_v26 }
  0x1c   :  { %233 = vmatpush1.bf16.msra.mxu0 %v830_v27  ;;  %286 = vmatpush1.bf16.msra.mxu1 %v831_v28 }
  0x1f   :  { %750 = vmatmul.mubr.msk.bf16.vlgmr.msra.gmra.mrb[0].mxu0 %vm213_vm0, %v832_v29  ;;  %752 = vmatmul.mubr.msk.bf16.vlgmr.msra.gmra.mrb[0].mxu1 %vm213_vm0, %v832_v29 }
  0x20   :  { %262 = vmatprep.mubr.bf16.mxu0 %v900_v1  ;;  %315 = vmatprep.mubr.bf16.mxu1 %v900_v1 }
  0x27   :  { %751 = vmatmul.mubr.msk.bf16.gmra.mrb[4].mxu0 %vm213_vm0, %v833_v30  ;;  %753 = vmatmul.mubr.msk.bf16.gmra.mrb[4].mxu1 %vm213_vm0, %v833_v30 }
  0xf2   :  { %v254_v32 = vpop.f32.mrb[0].mxu0  ;;  %v307_v33 = vpop.f32.mrb[0].mxu1 }
  0xf3   :  { %v363_v34 = vmul.f32 %v254_v32, %v254_v32  ;;  %v256_v35 = vpop.f32.mrb[1].mxu0  ;;  %v309_v36 = vpop.f32.mrb[1].mxu1  ;;  %v365_v45 = vmul.f32 %v307_v33, %v307_v33 }
  0xf4   :  { %v330_v37 = vadd.f32 %v256_v35, %v254_v32  ;;  %v364_v38 = vmul.f32 %v256_v35, %v256_v35  ;;  %v1031_v39 = vpack.c.bf16 %v256_v35, %v254_v32  ;;  %v1033_v40 = vpack.c.bf16 %v309_v36, %v307_v33  ;;  %v258_v41 = vpop.f32.mrb[2].mxu0  ;;  %v311_v42 = vpop.f32.mrb[2].mxu1  ;;  %v326_v32 = vld [vmem:[#allocation2] sm:$0xff] }
  0xf5   :  { %v260_v43 = vpop.f32.mrb[3].mxu0  ;;  %v313_v44 = vpop.f32.mrb[3].mxu1  ;;  %v367_v46 = vmul.f32 %v258_v41, %v258_v41  ;;  %v366_v61 = vmul.f32 %v309_v36, %v309_v36  ;;  %v369_v10 = vmul.f32 %v311_v42, %v311_v42  ;;  %v359_v35 = vld [vmem:[#allocation3] sm:$0xff] }
  0xf6   :  { %v335_v47 = vadd.f32 %v260_v43, %v258_v41  ;;  %v368_v48 = vmul.f32 %v260_v43, %v260_v43  ;;  %v1035_v49 = vpack.c.bf16 %v260_v43, %v258_v41  ;;  %v1037_v50 = vpack.c.bf16 %v313_v44, %v311_v42  ;;  %v360_v43 = vld [vmem:[#allocation3 + $0x8] sm:$0xff] }
  0xf7   :  { %v331_v51 = vadd.f32 %v330_v37, %v307_v33  ;;  %v379_v52 = vadd.f32 %v364_v38, %v363_v34  ;;  %v370_v16 = vmul.f32 %v313_v44, %v313_v44 }
  0xf8   :  { %v336_v57 = vadd.f32 %v335_v47, %v311_v42  ;;  %v384_v58 = vadd.f32 %v368_v48, %v367_v46 }
  0xf9   :  { %v332_v54 = vadd.f32 %v331_v51, %v309_v36  ;;  %v380_v56 = vadd.f32 %v379_v52, %v365_v45  ;;  %v327_v36 = vld [vmem:[#allocation2 + $0x8] sm:$0xff]  ;;  %v361_v51 = vld [vmem:[#allocation3 + $0x10] sm:$0xff]  ;;  %v329_v52 = vld [vmem:[#allocation2 + $0x18] sm:$0xff] }
  0xfa   :  { %v317_v53 = vpop.f32.mrb[4].mxu1  ;;  %v264_v55 = vpop.f32.mrb[4].mxu0  ;;  %v337_v9 = vadd.f32 %v336_v57, %v313_v44  ;;  %v385_v17 = vadd.f32 %v384_v58, %v369_v10  ;;  %v328_v44 = vld [vmem:[#allocation2 + $0x10] sm:$0xff]  ;;  %v362_v57 = vld [vmem:[#allocation3 + $0x18] sm:$0xff] }
  0xfb   :  { %v266_v59 = vpop.f32.mrb[5].mxu0  ;;  %v319_v60 = vpop.f32.mrb[5].mxu1  ;;  %333 = vadd.xlane.f32.xlu0 %v332_v54  ;;  %v371_v62 = vmul.f32 %v264_v55, %v264_v55  ;;  %v381_v5 = vadd.f32 %v380_v56, %v366_v61  ;;  %v373_v11 = vmul.f32 %v317_v53, %v317_v53 }
  0xfc   :  { %v340_v63 = vadd.f32 %v266_v59, %v264_v55  ;;  %v1039_v0 = vpack.c.bf16 %v266_v59, %v264_v55  ;;  %v1041_v1 = vpack.c.bf16 %v319_v60, %v317_v53  ;;  %v321_v2 = vpop.f32.mrb[6].mxu1  ;;  %v268_v3 = vpop.f32.mrb[6].mxu0  ;;  %v372_v4 = vmul.f32 %v266_v59, %v266_v59 }
  0xfd   :  { %v375_v6 = vmul.f32 %v268_v3, %v268_v3  ;;  %v270_v7 = vpop.f32.mrb[7].mxu0  ;;  %v323_v8 = vpop.f32.mrb[7].mxu1  ;;  %382 = vadd.xlane.f32.xlu1 %v381_v5  ;;  %v377_v19 = vmul.f32 %v321_v2, %v321_v2  ;;  %v386_v23 = vadd.f32 %v385_v17, %v370_v16  ;;  %v374_v25 = vmul.f32 %v319_v60, %v319_v60 }
  0xfe   :  { %v345_v12 = vadd.f32 %v270_v7, %v268_v3  ;;  %v376_v13 = vmul.f32 %v270_v7, %v270_v7  ;;  %v1043_v14 = vpack.c.bf16 %v270_v7, %v268_v3  ;;  %v1045_v15 = vpack.c.bf16 %v323_v8, %v321_v2 }
  0xff   :  { %338 = vadd.xlane.f32.xlu0 %v337_v9  ;;  %v341_v18 = vadd.f32 %v340_v63, %v317_v53  ;;  %v389_v21 = vadd.f32 %v372_v4, %v371_v62  ;;  %v378_v22 = vmul.f32 %v323_v8, %v323_v8 }
 0x100   :  { %v394_v20 = vadd.f32 %v376_v13, %v375_v6  ;;  %v346_v27 = vadd.f32 %v345_v12, %v321_v2 }
 0x101   :  { %v342_v24 = vadd.f32 %v341_v18, %v319_v60  ;;  %v390_v26 = vadd.f32 %v389_v21, %v373_v11 }
 0x102   :  { %v395_v28 = vadd.f32 %v394_v20, %v377_v19  ;;  %v347_v30 = vadd.f32 %v346_v27, %v323_v8  ;;  %v491_v19 = vld [vmem:[%s1167_s2] sm:$0xff]  ;;  %v505_v27 = vunpack.c.h.bf16 %v1031_v39 }
 0x103   :  { %387 = vadd.xlane.f32.xlu0 %v386_v23  ;;  %343 = vadd.xlane.f32.xlu1 %v342_v24  ;;  %v391_v29 = vadd.f32 %v390_v26, %v374_v25  ;;  %v504_v26 = vunpack.c.l.bf16 %v1031_v39  ;;  %v514_v39 = vunpack.c.l.bf16 %v1041_v1 }
 0x104   :  { %v396_v31 = vadd.f32 %v395_v28, %v378_v22  ;;  %v493_v22 = vld [vmem:[%s1168_s3] sm:$0xff]  ;;  %v506_v28 = vunpack.c.l.bf16 %v1033_v40 }
 0x107   :  { %392 = vadd.xlane.f32.xlu0 %v391_v29  ;;  %348 = vadd.xlane.f32.xlu1 %v347_v30  ;;  %v507_v29 = vunpack.c.h.bf16 %v1033_v40  ;;  %v508_v30 = vunpack.c.l.bf16 %v1035_v49 }
 0x10b   :  { %397 = vadd.xlane.f32.xlu1 %v396_v31  ;;  %v509_v31 = vunpack.c.h.bf16 %v1035_v49 }
 0x188   :  { %v334_v33 = vpop.xlane.xlu0 %333 }
 0x189   :  { %v350_v34 = vadd.f32 %v334_v33, %v326_v32  ;;  %v510_v32 = vunpack.c.l.bf16 %v1037_v50  ;;  %v511_v33 = vunpack.c.h.bf16 %v1037_v50  ;;  %v516_v50 = vunpack.c.l.bf16 %v1043_v14 }
 0x18a   :  { %v383_v37 = vpop.xlane.xlu1 %382 }
 0x18b   :  { %355 = vst.msk [vmem:[#allocation2] sm:$0xff] %vm22_vm1, %v350_v34  ;;  %v399_v38 = vadd.f32 %v383_v37, %v359_v35  ;;  %v512_v34 = vunpack.c.l.bf16 %v1039_v0 }
 0x18c   :  { %v339_v41 = vpop.xlane.xlu0 %338 }
 0x18d   :  { %v351_v42 = vadd.f32 %v339_v41, %v327_v36  ;;  %403 = vst.msk [vmem:[#allocation3] sm:$0xff] %vm22_vm1, %v399_v38  ;;  %v513_v38 = vunpack.c.h.bf16 %v1039_v0  ;;  %v515_v41 = vunpack.c.h.bf16 %v1041_v1  ;;  %v517_v0 = vunpack.c.h.bf16 %v1043_v14 }
 0x18e   :  { %v519_v1 = vunpack.c.h.bf16 %v1045_v15 }
 0x18f   :  { %356 = vst.msk [vmem:[#allocation2 + $0x8] sm:$0xff] %vm22_vm1, %v351_v42 }
 0x190   :  { %v388_v45 = vpop.xlane.xlu0 %387  ;;  %v344_v46 = vpop.xlane.xlu1 %343 }
 0x191   :  { %v400_v47 = vadd.f32 %v388_v45, %v360_v43  ;;  %v352_v48 = vadd.f32 %v344_v46, %v328_v44 }
 0x192   :  { %v471_v61 = vld [vmem:[#allocation2] sm:$0xff] }
 0x193   :  { %404 = vst.msk [vmem:[#allocation3 + $0x8] sm:$0xff] %vm22_vm1, %v400_v47  ;;  %357 = vst.msk [vmem:[#allocation2 + $0x10] sm:$0xff] %vm22_vm1, %v352_v48 }
 0x194   :  { %v393_v53 = vpop.xlane.xlu0 %392  ;;  %v349_v54 = vpop.xlane.xlu1 %348  ;;  %v475_v5 = vld [vmem:[#allocation3] sm:$0xff] }
 0x195   :  { %v401_v55 = vadd.f32 %v393_v53, %v361_v51  ;;  %v353_v56 = vadd.f32 %v349_v54, %v329_v52  ;;  %v518_v51 = vunpack.c.l.bf16 %v1045_v15 }
 0x196   :  { %v472_v59 = vld [vmem:[#allocation2 + $0x8] sm:$0xff] }
 0x197   :  { %405 = vst.msk [vmem:[#allocation3 + $0x10] sm:$0xff] %vm22_vm1, %v401_v55  ;;  %358 = vst.msk [vmem:[#allocation2 + $0x18] sm:$0xff] %vm22_vm1, %v353_v56  ;;  %v479_v63 = vadd.f32 %v472_v59, %v471_v61 }
 0x198   :  { %v398_v58 = vpop.xlane.xlu1 %397 }
 0x199   :  { %v402_v60 = vadd.f32 %v398_v58, %v362_v57 }
 0x19a   :  { %v473_v62 = vld [vmem:[#allocation2 + $0x10] sm:$0xff]  ;;  %v476_v2 = vld [vmem:[#allocation3 + $0x8] sm:$0xff] }
 0x19b   :  { %406 = vst.msk [vmem:[#allocation3 + $0x18] sm:$0xff] %vm22_vm1, %v402_v60  ;;  %v481_v3 = vadd.f32 %v479_v63, %v473_v62  ;;  %v480_v7 = vadd.f32 %v476_v2, %v475_v5 }
 0x19e   :  { %v474_v4 = vld [vmem:[#allocation2 + $0x18] sm:$0xff]  ;;  %v477_v6 = vld [vmem:[#allocation3 + $0x10] sm:$0xff] }
 0x19f   :  { %v483_v8 = vadd.f32 %v481_v3, %v474_v4  ;;  %v482_v9 = vadd.f32 %v480_v7, %v477_v6 }
 0x1a1   :  { %v485_v10 = vmul.f32 0.00048828125, %v483_v8 }
 0x1a2   :  { %v478_v11 = vld [vmem:[#allocation3 + $0x18] sm:$0xff] }
 0x1a3   :  { %v484_v12 = vadd.f32 %v482_v9, %v478_v11  ;;  %v487_v16 = vmul.f32 %v485_v10, %v485_v10 }
 0x1a5   :  { %v486_v13 = vmul.f32 0.00048828125, %v484_v12 }
 0x1a7   :  { %v488_v17 = vsub.f32 %v486_v13, %v487_v16 }
 0x1a9   :  { %v489_v18 = vadd.f32 1e-05, %v488_v17 }
 0x1ab   :  { %834 = vrsqrt.f32 %v489_v18 }
 0x1b5   :  { %v835_v20 = vpop.eup %834 }
 0x1b6   :  { %v492_v21 = vmul.f32 %v835_v20, %v491_v19 }
 0x1b8   :  { %522 = vperm.xlu0 %788, %v492_v21   ;;  %v494_v23 = vmul.f32 %v492_v21, %v485_v10 }
 0x1ba   :  { %v495_v24 = vsub.f32 %v493_v22, %v494_v23 }
 0x1bc   :  { %543 = vperm.xlu1 %789, %v495_v24  }
 0x237   :  { %v523_v25 = vpop.permute.xlu0 %522 }
 0x238   :  { %v525_v35 = vmul.f32 %v523_v25, %v504_v26  ;;  %v526_v36 = vmul.f32 %v523_v25, %v505_v27  ;;  %v527_v37 = vmul.f32 %v523_v25, %v506_v28  ;;  %v528_v40 = vmul.f32 %v523_v25, %v507_v29 }
 0x239   :  { %v529_v43 = vmul.f32 %v523_v25, %v508_v30  ;;  %v530_v46 = vmul.f32 %v523_v25, %v509_v31  ;;  %v531_v47 = vmul.f32 %v523_v25, %v510_v32  ;;  %v532_v53 = vmul.f32 %v523_v25, %v511_v33 }
 0x23a   :  { %v533_v54 = vmul.f32 %v523_v25, %v512_v34  ;;  %v534_v57 = vmul.f32 %v523_v25, %v513_v38  ;;  %v535_v14 = vmul.f32 %v523_v25, %v514_v39  ;;  %v536_v61 = vmul.f32 %v523_v25, %v515_v41 }
 0x23b   :  { %v544_v42 = vpop.permute.xlu1 %543  ;;  %v537_v63 = vmul.f32 %v523_v25, %v516_v50  ;;  %v538_v2 = vmul.f32 %v523_v25, %v517_v0  ;;  %v539_v5 = vmul.f32 %v523_v25, %v518_v51  ;;  %v540_v13 = vmul.f32 %v523_v25, %v519_v1 }
 0x23c   :  { %v1073_v44 = vadd.f32 %v544_v42, %v525_v35  ;;  %v1075_v49 = vadd.f32 %v544_v42, %v526_v36  ;;  %v1077_v45 = vadd.f32 %v544_v42, %v527_v37  ;;  %v1080_v48 = vadd.f32 %v544_v42, %v528_v40 }
 0x23d   :  { %v1085_v52 = vadd.f32 %v544_v42, %v529_v43  ;;  %v1087_v55 = vadd.f32 %v544_v42, %v530_v46  ;;  %v1089_v56 = vadd.f32 %v544_v42, %v531_v47  ;;  %v1094_v62 = vadd.f32 %v544_v42, %v532_v53 }
 0x23e   :  { %v562_v58 = vsub.f32 0.0, %v1073_v44  ;;  %v563_v59 = vsub.f32 0.0, %v1075_v49  ;;  %v564_v60 = vsub.f32 0.0, %v1077_v45  ;;  %v565_v15 = vsub.f32 0.0, %v1080_v48 }
 0x23f   :  { %v1097_v3 = vadd.f32 %v544_v42, %v533_v54  ;;  %v566_v4 = vsub.f32 0.0, %v1085_v52  ;;  %v1100_v6 = vadd.f32 %v544_v42, %v534_v57  ;;  %v567_v7 = vsub.f32 0.0, %v1087_v55 }
 0x240   :  { %v568_v8 = vsub.f32 0.0, %v1089_v56  ;;  %v1104_v9 = vadd.f32 %v544_v42, %v535_v14  ;;  %v578_v10 = vmul.f32 1.442695, %v562_v58  ;;  %v580_v11 = vmul.f32 1.442695, %v563_v59 }
 0x241   :  { %v582_v12 = vmul.f32 1.442695, %v564_v60  ;;  %v1106_v16 = vadd.f32 %v544_v42, %v536_v61  ;;  %v569_v17 = vsub.f32 0.0, %v1094_v62  ;;  %v584_v18 = vmul.f32 1.442695, %v565_v15 }
 0x242   :  { %v1109_v19 = vadd.f32 %v544_v42, %v537_v63  ;;  %v570_v20 = vsub.f32 0.0, %v1097_v3  ;;  %836 = vpow2.f32 %v578_v10  ;;  %v586_v21 = vmul.f32 1.442695, %v566_v4 }
 0x243   :  { %v1112_v22 = vadd.f32 %v544_v42, %v538_v2  ;;  %v571_v23 = vsub.f32 0.0, %v1100_v6  ;;  %838 = vpow2.f32 %v580_v11  ;;  %v588_v24 = vmul.f32 1.442695, %v567_v7 }
 0x244   :  { %v1115_v26 = vadd.f32 %v544_v42, %v539_v5  ;;  %v572_v25 = vsub.f32 0.0, %v1104_v9  ;;  %840 = vpow2.f32 %v582_v12  ;;  %v590_v27 = vmul.f32 1.442695, %v568_v8 }
 0x245   :  { %v1118_v28 = vadd.f32 %v544_v42, %v540_v13  ;;  %v573_v29 = vsub.f32 0.0, %v1106_v16  ;;  %842 = vpow2.f32 %v584_v18  ;;  %v592_v30 = vmul.f32 1.442695, %v569_v17 }
 0x246   :  { %v574_v31 = vsub.f32 0.0, %v1109_v19  ;;  %844 = vpow2.f32 %v586_v21  ;;  %v594_v32 = vmul.f32 1.442695, %v570_v20  ;;  %v575_v33 = vsub.f32 0.0, %v1112_v22 }
 0x247   :  { %846 = vpow2.f32 %v588_v24  ;;  %v596_v34 = vmul.f32 1.442695, %v571_v23  ;;  %v576_v35 = vsub.f32 0.0, %v1115_v26  ;;  %v598_v36 = vmul.f32 1.442695, %v572_v25 }
 0x248   :  { %848 = vpow2.f32 %v590_v27  ;;  %v577_v37 = vsub.f32 0.0, %v1118_v28  ;;  %v600_v38 = vmul.f32 1.442695, %v573_v29  ;;  %v602_v39 = vmul.f32 1.442695, %v574_v31 }
 0x249   :  { %850 = vpow2.f32 %v592_v30  ;;  %v604_v41 = vmul.f32 1.442695, %v575_v33  ;;  %v606_v42 = vmul.f32 1.442695, %v576_v35 }
 0x24a   :  { %852 = vpow2.f32 %v594_v32  ;;  %v608_v50 = vmul.f32 1.442695, %v577_v37 }
 0x24b   :  { %854 = vpow2.f32 %v596_v34 }
 0x24c   :  { %v837_v40 = vpop.eup %836  ;;  %856 = vpow2.f32 %v598_v36 }
 0x24d   :  { %v839_v43 = vpop.eup %838  ;;  %858 = vpow2.f32 %v600_v38  ;;  %v610_v47 = vadd.f32 1.0, %v837_v40 }
 0x24e   :  { %v841_v46 = vpop.eup %840  ;;  %860 = vpow2.f32 %v602_v39  ;;  %v611_v51 = vadd.f32 1.0, %v839_v43 }
 0x24f   :  { %v843_v0 = vpop.eup %842  ;;  %862 = vpow2.f32 %v604_v41  ;;  %v612_v53 = vadd.f32 1.0, %v841_v46 }
 0x250   :  { %v845_v1 = vpop.eup %844  ;;  %864 = vpow2.f32 %v606_v42  ;;  %v613_v57 = vadd.f32 1.0, %v843_v0 }
 0x251   :  { %v847_v54 = vpop.eup %846  ;;  %866 = vpow2.f32 %v608_v50  ;;  %v614_v59 = vadd.f32 1.0, %v845_v1 }
 0x252   :  { %v849_v58 = vpop.eup %848  ;;  %868 = vrcp.f32 %v610_v47  ;;  %v615_v14 = vadd.f32 1.0, %v847_v54 }
 0x253   :  { %v851_v60 = vpop.eup %850  ;;  %870 = vrcp.f32 %v611_v51  ;;  %v616_v15 = vadd.f32 1.0, %v849_v58 }
 0x254   :  { %v853_v61 = vpop.eup %852  ;;  %872 = vrcp.f32 %v612_v53  ;;  %v617_v2 = vadd.f32 1.0, %v851_v60 }
 0x255   :  { %v855_v63 = vpop.eup %854  ;;  %874 = vrcp.f32 %v613_v57  ;;  %v618_v5 = vadd.f32 1.0, %v853_v61 }
 0x256   :  { %v857_v4 = vpop.eup %856  ;;  %876 = vrcp.f32 %v614_v59  ;;  %v619_v8 = vadd.f32 1.0, %v855_v63 }
 0x257   :  { %v859_v7 = vpop.eup %858  ;;  %878 = vrcp.f32 %v615_v14  ;;  %v620_v11 = vadd.f32 1.0, %v857_v4 }
 0x258   :  { %v861_v10 = vpop.eup %860  ;;  %880 = vrcp.f32 %v616_v15  ;;  %v621_v13 = vadd.f32 1.0, %v859_v7 }
 0x259   :  { %v863_v12 = vpop.eup %862  ;;  %882 = vrcp.f32 %v617_v2  ;;  %v622_v18 = vadd.f32 1.0, %v861_v10 }
 0x25a   :  { %v865_v17 = vpop.eup %864  ;;  %884 = vrcp.f32 %v618_v5  ;;  %v623_v21 = vadd.f32 1.0, %v863_v12 }
 0x25b   :  { %v867_v20 = vpop.eup %866  ;;  %886 = vrcp.f32 %v619_v8  ;;  %v624_v24 = vadd.f32 1.0, %v865_v17 }
 0x25c   :  { %v869_v23 = vpop.eup %868  ;;  %888 = vrcp.f32 %v620_v11  ;;  %v625_v27 = vadd.f32 1.0, %v867_v20 }
 0x25d   :  { %v871_v25 = vpop.eup %870  ;;  %890 = vrcp.f32 %v621_v13  ;;  %v642_v29 = vmul.f32 %v869_v23, %v1073_v44 }
 0x25e   :  { %v873_v30 = vpop.eup %872  ;;  %892 = vrcp.f32 %v622_v18  ;;  %v643_v31 = vmul.f32 %v871_v25, %v1075_v49 }
 0x25f   :  { %v875_v32 = vpop.eup %874  ;;  %894 = vrcp.f32 %v623_v21  ;;  %v644_v33 = vmul.f32 %v873_v30, %v1077_v45 }
 0x260   :  { %v877_v34 = vpop.eup %876  ;;  %896 = vrcp.f32 %v624_v24  ;;  %v645_v35 = vmul.f32 %v875_v32, %v1080_v48  ;;  %v778_v36 = vpack.c.bf16 %v643_v31, %v642_v29 }
 0x261   :  { %v879_v37 = vpop.eup %878  ;;  %898 = vrcp.f32 %v625_v27  ;;  %v646_v38 = vmul.f32 %v877_v34, %v1085_v52 }
 0x262   :  { %v881_v39 = vpop.eup %880  ;;  %v647_v44 = vmul.f32 %v879_v37, %v1087_v55  ;;  %v779_v41 = vpack.c.bf16 %v645_v35, %v644_v33  ;;  %706 = vst [vmem:[%s1169_s4] sm:$0xff] %v778_v36 }
 0x263   :  { %v883_v49 = vpop.eup %882  ;;  %v648_v45 = vmul.f32 %v881_v39, %v1089_v56 }
 0x264   :  { %v885_v40 = vpop.eup %884  ;;  %v649_v42 = vmul.f32 %v883_v49, %v1094_v62  ;;  %v780_v48 = vpack.c.bf16 %v647_v44, %v646_v38  ;;  %707 = vst [vmem:[%s1169_s4 + $0x8] sm:$0xff] %v779_v41 }
 0x265   :  { %v887_v52 = vpop.eup %886  ;;  %v650_v43 = vmul.f32 %v885_v40, %v1097_v3 }
 0x266   :  { %v889_v55 = vpop.eup %888  ;;  %v651_v50 = vmul.f32 %v887_v52, %v1100_v6  ;;  %v781_v46 = vpack.c.bf16 %v649_v42, %v648_v45  ;;  %708 = vst [vmem:[%s1169_s4 + $0x10] sm:$0xff] %v780_v48 }
 0x267   :  { %v891_v56 = vpop.eup %890  ;;  %v652_v47 = vmul.f32 %v889_v55, %v1104_v9 }
 0x268   :  { %v893_v62 = vpop.eup %892  ;;  %v653_v0 = vmul.f32 %v891_v56, %v1106_v16  ;;  %v782_v51 = vpack.c.bf16 %v651_v50, %v650_v43  ;;  %709 = vst [vmem:[%s1169_s4 + $0x18] sm:$0xff] %v781_v46 }
 0x269   :  { %v895_v3 = vpop.eup %894  ;;  %v654_v1 = vmul.f32 %v893_v62, %v1109_v19 }
 0x26a   :  { %v897_v6 = vpop.eup %896  ;;  %v655_v53 = vmul.f32 %v895_v3, %v1112_v22  ;;  %v783_v54 = vpack.c.bf16 %v653_v0, %v652_v47  ;;  %710 = vst [vmem:[%s1169_s4 + $0x20] sm:$0xff] %v782_v51 }
 0x26b   :  { %v899_v9 = vpop.eup %898  ;;  %v656_v57 = vmul.f32 %v897_v6, %v1115_v26 }
 0x26c   :  { %v657_v16 = vmul.f32 %v899_v9, %v1118_v28  ;;  %v784_v58 = vpack.c.bf16 %v655_v53, %v654_v1  ;;  %711 = vst [vmem:[%s1169_s4 + $0x28] sm:$0xff] %v783_v54 }
 0x26e   :  { %v785_v59 = vpack.c.bf16 %v657_v16, %v656_v57  ;;  %712 = vst [vmem:[%s1169_s4 + $0x30] sm:$0xff] %v784_v58 }
 0x270   :  { %713 = vst [vmem:[%s1169_s4 + $0x38] sm:$0xff] %v785_v59 }

</bundles_post_ra>
